<compile_context>
chip_gen: v7x
topology: tpu7x:2x2x1
jax: 0.10.0
libtpu: 0.0.40
codegen_flags: <defaults>
</compile_context>

<pallas_src>
import functools

import jax
import jax.numpy as jnp
from jax.experimental import pallas as pl
from jax.experimental.pallas import tpu as pltpu


HIDDEN = 512
EMBED_DIM = 32
NUM_HEADS = 3
OUT_LANES = 128  # lane-dense output slab; q1/q2/q3 in lanes 0..2


def _round_up(x, m):
    return ((x + m - 1) // m) * m


# ----------------------------------------------------------------------------
# Fused kernel: all 3 critic heads, one batch tile per grid step.
#   h1      = relu(xu @ W1cat + b1cat)                  (TB, 3H)   bf16
#   h2_h    = relu(h1[:, hH:(h+1)H] @ W2[h] + b2_h)     (TB, H)    bf16
#   q_slab  = concat(h2_h) @ W3pad + b3pad              (TB, 128)  f32
# ----------------------------------------------------------------------------
def _critic_fused_kernel(xu_ref, w1_ref, b1_ref, w2_ref, b2_ref,
                         w3_ref, b3_ref, q_ref):
    xu = xu_ref[...]                                              # (TB, Din) bf16
    h1 = jnp.dot(xu, w1_ref[...], preferred_element_type=jnp.float32)
    h1 = jnp.maximum(h1 + b1_ref[...], 0.0).astype(jnp.bfloat16)  # (TB, 3H)

    h2_parts = []
    for h in range(NUM_HEADS):
        sl = slice(h * HIDDEN, (h + 1) * HIDDEN)                  # lane-aligned
        h2 = jnp.dot(h1[:, sl], w2_ref[h],
                     preferred_element_type=jnp.float32)
        h2 = jnp.maximum(h2 + b2_ref[:, sl], 0.0).astype(jnp.bfloat16)
        h2_parts.append(h2)
    h2_cat = jnp.concatenate(h2_parts, axis=-1)                   # (TB, 3H) bf16

    q = jnp.dot(h2_cat, w3_ref[...], preferred_element_type=jnp.float32)
    q_ref[...] = q + b3_ref[...]                                  # (TB, 128) f32


# ----------------------------------------------------------------------------
# Parameter construction (mirrors PyTorch: xavier_normal_ weights, zero biases,
# nn.Embedding default N(0,1)).  Weights stored as (in, out).
# ----------------------------------------------------------------------------
def init_critic_params(key, state_dim, action_dim=7, p_action_dim=5,
                       embed_dim=EMBED_DIM, hidden=HIDDEN):
    input_dim = state_dim + action_dim + embed_dim
    keys = jax.random.split(key, 10)

    def xavier_linear(k, fan_in, fan_out):
        std = (2.0 / (fan_in + fan_out)) ** 0.5
        w = std * jax.random.normal(k, (fan_in, fan_out), jnp.float32)
        b = jnp.zeros((1, fan_out), jnp.float32)
        return w, b

    params = {"embed": jax.random.normal(keys[0], (p_action_dim, embed_dim),
                                         jnp.float32)}
    dims = [(input_dim, hidden), (hidden, hidden), (hidden, 1)]
    for head, base in zip(("1", "2", "3"), (1, 4, 7)):
        for j, (fi, fo) in enumerate(dims):
            w, b = xavier_linear(keys[base + j], fi, fo)
            params[f"w{head}_{j}"] = w
            params[f"b{head}_{j}"] = b
    return params


def pack_critic_params(params):
    """Pack per-head f32 params into fused, kernel-friendly (bf16) tensors."""
    w1 = jnp.concatenate([params[f"w{h}_0"] for h in "123"], axis=1)  # (Din, 3H)
    b1 = jnp.concatenate([params[f"b{h}_0"] for h in "123"], axis=1)  # (1, 3H)
    w2 = jnp.stack([params[f"w{h}_1"] for h in "123"], axis=0)        # (3, H, H)
    b2 = jnp.concatenate([params[f"b{h}_1"] for h in "123"], axis=1)  # (1, 3H)

    # Block-placed third layer: column h holds head h's (H,) weight vector so a
    # single MXU pass yields a lane-dense (TB, 128) output slab.
    w3 = jnp.zeros((NUM_HEADS * HIDDEN, OUT_LANES), jnp.float32)
    b3 = jnp.zeros((1, OUT_LANES), jnp.float32)
    for i, h in enumerate("123"):
        w3 = w3.at[i * HIDDEN:(i + 1) * HIDDEN, i].set(params[f"w{h}_2"][:, 0])
        b3 = b3.at[0, i].set(params[f"b{h}_2"][0, 0])

    return {
        "embed": params["embed"],
        "w1": w1.astype(jnp.bfloat16),
        "b1": b1,                       # f32
        "w2": w2.astype(jnp.bfloat16),
        "b2": b2,                       # f32
        "w3": w3.astype(jnp.bfloat16),
        "b3": b3,                       # f32
    }


# ----------------------------------------------------------------------------
# Forward pass (matches Critic.forward semantics): returns (q1, q2, q3), (B,1) each.
# tile_b: 256 for v6e/v7x, 128 for v5e.
# ----------------------------------------------------------------------------
@functools.partial(jax.jit, static_argnames=("tile_b",))
def critic_forward(packed, x, u, p_action_id, tile_b=256):
    B = x.shape[0]
    p_ids = p_action_id.reshape(-1)
    p_embed = jnp.take(packed["embed"], p_ids, axis=0)            # (B, 32)
    xu = jnp.concatenate([x, u, p_embed], axis=-1).astype(jnp.bfloat16)
    d_in = xu.shape[1]
    h3 = NUM_HEADS * HIDDEN

    # Batch tiling: pad to sublane multiple, tile by tile_b for large batches.
    if B <= tile_b:
        tb = max(_round_up(B, 8), 8)
        bp = tb
    else:
        tb = tile_b
        bp = _round_up(B, tb)
    if bp != B:
        xu = jnp.pad(xu, ((0, bp - B), (0, 0)))

    flops = 2 * bp * (d_in * h3 + NUM_HEADS * HIDDEN * HIDDEN + h3 * OUT_LANES)
    bytes_accessed = (xu.size * 2
                      + (packed["w1"].size + packed["w2"].size
                         + packed["w3"].size) * 2
                      + (packed["b1"].size + packed["b2"].size
                         + packed["b3"].size) * 4
                      + bp * OUT_LANES * 4)

    q_slab = pl.pallas_call(
        _critic_fused_kernel,
        out_shape=jax.ShapeDtypeStruct((bp, OUT_LANES), jnp.float32),
        grid_spec=pltpu.PrefetchScalarGridSpec(
            num_scalar_prefetch=0,
            grid=(bp // tb,),
            in_specs=[
                pl.BlockSpec((tb, d_in), lambda i: (i, 0)),                  # xu
                pl.BlockSpec((d_in, h3), lambda i: (0, 0)),                  # w1
                pl.BlockSpec((1, h3), lambda i: (0, 0)),                     # b1
                pl.BlockSpec((NUM_HEADS, HIDDEN, HIDDEN),
                             lambda i: (0, 0, 0)),                           # w2
                pl.BlockSpec((1, h3), lambda i: (0, 0)),                     # b2
                pl.BlockSpec((h3, OUT_LANES), lambda i: (0, 0)),             # w3
                pl.BlockSpec((1, OUT_LANES), lambda i: (0, 0)),              # b3
            ],
            out_specs=pl.BlockSpec((tb, OUT_LANES), lambda i: (i, 0)),
        ),
        compiler_params=pltpu.CompilerParams(
            dimension_semantics=("parallel",)),
        cost_estimate=pl.CostEstimate(
            flops=flops, transcendentals=0, bytes_accessed=bytes_accessed),
    )(xu, packed["w1"], packed["b1"], packed["w2"], packed["b2"],
      packed["w3"], packed["b3"])

    return q_slab[:B, 0:1], q_slab[:B, 1:2], q_slab[:B, 2:3]


# ----------------------------------------------------------------------------
# Pure-JAX references for verification
# ----------------------------------------------------------------------------
def critic_forward_ref_bf16(packed, x, u, p_action_id):
    """Emulates the kernel's bf16-with-f32-accumulation math in plain JAX."""
    p_ids = p_action_id.reshape(-1)
    p_embed = jnp.take(packed["embed"], p_ids, axis=0)
    xu = jnp.concatenate([x, u, p_embed], axis=-1)
    xu = xu.astype(jnp.bfloat16).astype(jnp.float32)
    w1 = packed["w1"].astype(jnp.float32)
    w2 = packed["w2"].astype(jnp.float32)
    w3 = packed["w3"].astype(jnp.float32)
    h1 = jnp.maximum(xu @ w1 + packed["b1"], 0.0)
    h1 = h1.astype(jnp.bfloat16).astype(jnp.float32)
    parts = []
    for h in range(NUM_HEADS):
        sl = slice(h * HIDDEN, (h + 1) * HIDDEN)
        h2 = jnp.maximum(h1[:, sl] @ w2[h] + packed["b2"][:, sl], 0.0)
        parts.append(h2.astype(jnp.bfloat16).astype(jnp.float32))
    q = jnp.concatenate(parts, axis=-1) @ w3 + packed["b3"]
    return q[:, 0:1], q[:, 1:2], q[:, 2:3]


def critic_forward_ref_f32(params, x, u, p_action_id):
    """Full-precision reference using the original per-head f32 params."""
    p_ids = p_action_id.reshape(-1)
    p_embed = jnp.take(params["embed"], p_ids, axis=0)
    xu = jnp.concatenate([x, u, p_embed], axis=-1)

    def head(h):
        a = jnp.maximum(xu @ params[f"w{h}_0"] + params[f"b{h}_0"], 0.0)
        a = jnp.maximum(a @ params[f"w{h}_1"] + params[f"b{h}_1"], 0.0)
        return a @ params[f"w{h}_2"] + params[f"b{h}_2"]

    return head("1"), head("2"), head("3")


if __name__ == "__main__":
    key = jax.random.PRNGKey(0)
    k_param, k_x, k_u, k_id = jax.random.split(key, 4)

    batch = 4
    state_dim = 17
    action_dim = 7
    p_action_dim = 5

    params = init_critic_params(k_param, state_dim, action_dim, p_action_dim)
    packed = pack_critic_params(params)

    x = jax.random.normal(k_x, (batch, state_dim), jnp.float32)
    u = jax.random.normal(k_u, (batch, action_dim), jnp.float32)
    p_action_id = jax.random.randint(k_id, (batch, 1), 0, p_action_dim,
                                     dtype=jnp.int32)

    q1, q2, q3 = critic_forward(packed, x, u, p_action_id)
    jax.block_until_ready((q1, q2, q3))

    # Tight check vs. a reference that mirrors the kernel's bf16/f32 math.
    r1, r2, r3 = critic_forward_ref_bf16(packed, x, u, p_action_id)
    assert q1.shape == (batch, 1) and q2.shape == (batch, 1) and q3.shape == (batch, 1)
    assert jnp.allclose(q1, r1, atol=1e-2, rtol=1e-2)
    assert jnp.allclose(q2, r2, atol=1e-2, rtol=1e-2)
    assert jnp.allclose(q3, r3, atol=1e-2, rtol=1e-2)

    # Loose semantic check vs. the full-f32 original parameters.
    f1, f2, f3 = critic_forward_ref_f32(params, x, u, p_action_id)
    assert jnp.allclose(q1, f1, atol=1e-1, rtol=1e-1)
    assert jnp.allclose(q2, f2, atol=1e-1, rtol=1e-1)
    assert jnp.allclose(q3, f3, atol=1e-1, rtol=1e-1)

    print("KERNEL_OK")
</pallas_src>

<mosaic_0001>
module attributes {stable_mosaic.version = 11 : i64} {
  func.func @_critic_fused_kernel(%arg0: i32, %arg1: memref<8x56xbf16, #tpu.memory_space<vmem>>, %arg2: memref<56x1536xbf16, #tpu.memory_space<vmem>>, %arg3: memref<1x1536xf32, #tpu.memory_space<vmem>>, %arg4: memref<3x512x512xbf16, #tpu.memory_space<vmem>>, %arg5: memref<1x1536xf32, #tpu.memory_space<vmem>>, %arg6: memref<1536x128xbf16, #tpu.memory_space<vmem>>, %arg7: memref<1x128xf32, #tpu.memory_space<vmem>>, %arg8: memref<8x128xf32, #tpu.memory_space<vmem>>) attributes {dimension_semantics = [#tpu.dimension_semantics<parallel>], iteration_bounds = array<i64: 1>, scalar_prefetch = 0 : i64, scratch_operands = 0 : i64, tpu.core_type = #tpu.core_type<tc>, window_params = [{transform_indices = @transform_0, window_bounds = array<i64: 8, 56>}, {pipeline_mode = #tpu.pipeline_mode<synchronous>, transform_indices = @transform_1, window_bounds = array<i64: 56, 1536>}, {pipeline_mode = #tpu.pipeline_mode<synchronous>, transform_indices = @transform_2, window_bounds = array<i64: 1, 1536>}, {pipeline_mode = #tpu.pipeline_mode<synchronous>, transform_indices = @transform_3, window_bounds = array<i64: 3, 512, 512>}, {pipeline_mode = #tpu.pipeline_mode<synchronous>, transform_indices = @transform_4, window_bounds = array<i64: 1, 1536>}, {pipeline_mode = #tpu.pipeline_mode<synchronous>, transform_indices = @transform_5, window_bounds = array<i64: 1536, 128>}, {pipeline_mode = #tpu.pipeline_mode<synchronous>, transform_indices = @transform_6, window_bounds = array<i64: 1, 128>}, {transform_indices = @transform_7, window_bounds = array<i64: 8, 128>}]} {
    %c0 = arith.constant 0 : index
    %c0_0 = arith.constant 0 : index
    %0 = vector.load %arg1[%c0, %c0_0] : memref<8x56xbf16, #tpu.memory_space<vmem>>, vector<8x56xbf16>
    %c0_1 = arith.constant 0 : index
    %c0_2 = arith.constant 0 : index
    %1 = vector.load %arg2[%c0_1, %c0_2] : memref<56x1536xbf16, #tpu.memory_space<vmem>>, vector<56x1536xbf16>
    %cst = arith.constant dense<0.000000e+00> : vector<8x1536xf32>
    %2 = tpu.matmul %0, %1, %cst {dimension_numbers = #tpu.dot_dimension_numbers<[1], [0], [0], [1], [0, 0, 1, 1], [], []>} : vector<8x56xbf16>, vector<56x1536xbf16>, vector<8x1536xf32> -> vector<8x1536xf32>
    %c0_3 = arith.constant 0 : index
    %c0_4 = arith.constant 0 : index
    %3 = vector.load %arg3[%c0_3, %c0_4] : memref<1x1536xf32, #tpu.memory_space<vmem>>, vector<1x1536xf32>
    %4 = vector.broadcast %3 : vector<1x1536xf32> to vector<8x1536xf32>
    %5 = arith.addf %2, %4 : vector<8x1536xf32>
    %cst_5 = arith.constant 0.000000e+00 : f32
    %6 = vector.broadcast %cst_5 : f32 to vector<8x1536xf32>
    %7 = arith.maximumf %5, %6 : vector<8x1536xf32>
    %8 = arith.truncf %7 : vector<8x1536xf32> to vector<8x1536xbf16>
    %9 = vector.extract_strided_slice %8 {offsets = [0, 0], sizes = [8, 512], strides = [1, 1]} : vector<8x1536xbf16> to vector<8x512xbf16>
    %c0_6 = arith.constant 0 : index
    %c0_7 = arith.constant 0 : index
    %c0_8 = arith.constant 0 : index
    %10 = vector.load %arg4[%c0_6, %c0_7, %c0_8] : memref<3x512x512xbf16, #tpu.memory_space<vmem>>, vector<1x512x512xbf16>
    %11 = vector.shape_cast %10 : vector<1x512x512xbf16> to vector<512x512xbf16>
    %cst_9 = arith.constant dense<0.000000e+00> : vector<8x512xf32>
    %12 = tpu.matmul %9, %11, %cst_9 {dimension_numbers = #tpu.dot_dimension_numbers<[1], [0], [0], [1], [0, 0, 1, 1], [], []>} : vector<8x512xbf16>, vector<512x512xbf16>, vector<8x512xf32> -> vector<8x512xf32>
    %c0_10 = arith.constant 0 : index
    %c0_11 = arith.constant 0 : index
    %13 = vector.load %arg5[%c0_10, %c0_11] : memref<1x1536xf32, #tpu.memory_space<vmem>>, vector<1x512xf32>
    %14 = vector.broadcast %13 : vector<1x512xf32> to vector<8x512xf32>
    %15 = arith.addf %12, %14 : vector<8x512xf32>
    %cst_12 = arith.constant 0.000000e+00 : f32
    %16 = vector.broadcast %cst_12 : f32 to vector<8x512xf32>
    %17 = arith.maximumf %15, %16 : vector<8x512xf32>
    %18 = arith.truncf %17 : vector<8x512xf32> to vector<8x512xbf16>
    %19 = vector.extract_strided_slice %8 {offsets = [0, 512], sizes = [8, 512], strides = [1, 1]} : vector<8x1536xbf16> to vector<8x512xbf16>
    %c1 = arith.constant 1 : index
    %c0_13 = arith.constant 0 : index
    %c0_14 = arith.constant 0 : index
    %20 = vector.load %arg4[%c1, %c0_13, %c0_14] : memref<3x512x512xbf16, #tpu.memory_space<vmem>>, vector<1x512x512xbf16>
    %21 = vector.shape_cast %20 : vector<1x512x512xbf16> to vector<512x512xbf16>
    %cst_15 = arith.constant dense<0.000000e+00> : vector<8x512xf32>
    %22 = tpu.matmul %19, %21, %cst_15 {dimension_numbers = #tpu.dot_dimension_numbers<[1], [0], [0], [1], [0, 0, 1, 1], [], []>} : vector<8x512xbf16>, vector<512x512xbf16>, vector<8x512xf32> -> vector<8x512xf32>
    %c0_16 = arith.constant 0 : index
    %c512 = arith.constant 512 : index
    %23 = vector.load %arg5[%c0_16, %c512] : memref<1x1536xf32, #tpu.memory_space<vmem>>, vector<1x512xf32>
    %24 = vector.broadcast %23 : vector<1x512xf32> to vector<8x512xf32>
    %25 = arith.addf %22, %24 : vector<8x512xf32>
    %cst_17 = arith.constant 0.000000e+00 : f32
    %26 = vector.broadcast %cst_17 : f32 to vector<8x512xf32>
    %27 = arith.maximumf %25, %26 : vector<8x512xf32>
    %28 = arith.truncf %27 : vector<8x512xf32> to vector<8x512xbf16>
    %29 = vector.extract_strided_slice %8 {offsets = [0, 1024], sizes = [8, 512], strides = [1, 1]} : vector<8x1536xbf16> to vector<8x512xbf16>
    %c2 = arith.constant 2 : index
    %c0_18 = arith.constant 0 : index
    %c0_19 = arith.constant 0 : index
    %30 = vector.load %arg4[%c2, %c0_18, %c0_19] : memref<3x512x512xbf16, #tpu.memory_space<vmem>>, vector<1x512x512xbf16>
    %31 = vector.shape_cast %30 : vector<1x512x512xbf16> to vector<512x512xbf16>
    %cst_20 = arith.constant dense<0.000000e+00> : vector<8x512xf32>
    %32 = tpu.matmul %29, %31, %cst_20 {dimension_numbers = #tpu.dot_dimension_numbers<[1], [0], [0], [1], [0, 0, 1, 1], [], []>} : vector<8x512xbf16>, vector<512x512xbf16>, vector<8x512xf32> -> vector<8x512xf32>
    %c0_21 = arith.constant 0 : index
    %c1024 = arith.constant 1024 : index
    %33 = vector.load %arg5[%c0_21, %c1024] : memref<1x1536xf32, #tpu.memory_space<vmem>>, vector<1x512xf32>
    %34 = vector.broadcast %33 : vector<1x512xf32> to vector<8x512xf32>
    %35 = arith.addf %32, %34 : vector<8x512xf32>
    %cst_22 = arith.constant 0.000000e+00 : f32
    %36 = vector.broadcast %cst_22 : f32 to vector<8x512xf32>
    %37 = arith.maximumf %35, %36 : vector<8x512xf32>
    %38 = arith.truncf %37 : vector<8x512xf32> to vector<8x512xbf16>
    %39 = tpu.concatenate %18, %28, %38 in 1 : vector<8x512xbf16>, vector<8x512xbf16>, vector<8x512xbf16> -> vector<8x1536xbf16>
    %c0_23 = arith.constant 0 : index
    %c0_24 = arith.constant 0 : index
    %40 = vector.load %arg6[%c0_23, %c0_24] : memref<1536x128xbf16, #tpu.memory_space<vmem>>, vector<1536x128xbf16>
    %cst_25 = arith.constant dense<0.000000e+00> : vector<8x128xf32>
    %41 = tpu.matmul %39, %40, %cst_25 {dimension_numbers = #tpu.dot_dimension_numbers<[1], [0], [0], [1], [0, 0, 1, 1], [], []>} : vector<8x1536xbf16>, vector<1536x128xbf16>, vector<8x128xf32> -> vector<8x128xf32>
    %c0_26 = arith.constant 0 : index
    %c0_27 = arith.constant 0 : index
    %42 = vector.load %arg7[%c0_26, %c0_27] : memref<1x128xf32, #tpu.memory_space<vmem>>, vector<1x128xf32>
    %43 = vector.broadcast %42 : vector<1x128xf32> to vector<8x128xf32>
    %44 = arith.addf %41, %43 : vector<8x128xf32>
    %c0_28 = arith.constant 0 : index
    %c0_29 = arith.constant 0 : index
    %45 = vector.load %arg8[%c0_28, %c0_29] : memref<8x128xf32, #tpu.memory_space<vmem>>, vector<8x128xf32>
    tpu.vector_store %arg8[%c0_28, %c0_29], %44 {strides = array<i32>} : memref<8x128xf32, #tpu.memory_space<vmem>>, vector<8x128xf32>,
    return
  }
  func.func @transform_0(%arg0: i32) -> (i32, i32) {
    %c0_i32 = arith.constant 0 : i32
    %c0_i32_0 = arith.constant 0 : i32
    return %arg0, %c0_i32 : i32, i32
  }
  func.func @transform_1(%arg0: i32) -> (i32, i32) {
    %c0_i32 = arith.constant 0 : i32
    %c0_i32_0 = arith.constant 0 : i32
    %c0_i32_1 = arith.constant 0 : i32
    return %c0_i32, %c0_i32_0 : i32, i32
  }
  func.func @transform_2(%arg0: i32) -> (i32, i32) {
    %c0_i32 = arith.constant 0 : i32
    %c0_i32_0 = arith.constant 0 : i32
    %c0_i32_1 = arith.constant 0 : i32
    return %c0_i32, %c0_i32_0 : i32, i32
  }
  func.func @transform_3(%arg0: i32) -> (i32, i32, i32) {
    %c0_i32 = arith.constant 0 : i32
    %c0_i32_0 = arith.constant 0 : i32
    %c0_i32_1 = arith.constant 0 : i32
    %c0_i32_2 = arith.constant 0 : i32
    return %c0_i32, %c0_i32_0, %c0_i32_1 : i32, i32, i32
  }
  func.func @transform_4(%arg0: i32) -> (i32, i32) {
    %c0_i32 = arith.constant 0 : i32
    %c0_i32_0 = arith.constant 0 : i32
    %c0_i32_1 = arith.constant 0 : i32
    return %c0_i32, %c0_i32_0 : i32, i32
  }
  func.func @transform_5(%arg0: i32) -> (i32, i32) {
    %c0_i32 = arith.constant 0 : i32
    %c0_i32_0 = arith.constant 0 : i32
    %c0_i32_1 = arith.constant 0 : i32
    return %c0_i32, %c0_i32_0 : i32, i32
  }
  func.func @transform_6(%arg0: i32) -> (i32, i32) {
    %c0_i32 = arith.constant 0 : i32
    %c0_i32_0 = arith.constant 0 : i32
    %c0_i32_1 = arith.constant 0 : i32
    return %c0_i32, %c0_i32_0 : i32, i32
  }
  func.func @transform_7(%arg0: i32) -> (i32, i32) {
    %c0_i32 = arith.constant 0 : i32
    %c0_i32_0 = arith.constant 0 : i32
    return %arg0, %c0_i32 : i32, i32
  }
}

</mosaic_0001>

<bundles_post_ra>
// kernel: critic_forward.1
= control target key start
LH: loop header
LB: loop body
LE: loop exit
PB: predicated region body
PF: predicated region fallthrough
CT: control target
= control target key end

     0   :  { %12 = vsyncpa [#allocation3], 0  ;;  %s6505_s0 = inlined_call_operand.vmem [shape: bf16[8,56], index: 0, kind: input, shape index: {}]   ;;  %s6506_s1 = inlined_call_operand.hbm [shape: bf16[56,1536], index: 1, kind: input, shape index: {}]   ;;  %s6507_s2 = inlined_call_operand.hbm [shape: f32[1,1536], index: 2, kind: input, shape index: {}]   ;;  %s6508_s3 = inlined_call_operand.hbm [shape: bf16[3,512,512], index: 3, kind: input, shape index: {}]   ;;  %s6509_s4 = inlined_call_operand.hbm [shape: f32[1,1536], index: 4, kind: input, shape index: {}]   ;;  %s6510_s5 = inlined_call_operand.hbm [shape: bf16[1536,128], index: 5, kind: input, shape index: {}]   ;;  %s6511_s6 = inlined_call_operand.hbm [shape: f32[1,128], index: 6, kind: input, shape index: {}]   ;;  %s6512_s7 = inlined_call_operand.vmem [shape: f32[8,128], index: 7, kind: output, shape index: {}]  }
   0x1   :  { %13 = vsyncpa [#allocation5], 0 }
   0x2   :  { %14 = vsyncpa [#allocation8], 0 }
   0x3   :  { %15 = vsyncpa [#allocation11], 0  ;;  %s6245_s24 = smov [#allocation4]   ;;  %s6246_s26 = smov [#allocation7]  }
   0x4   :  { %s36_s25 = sshll.u32 %s6245_s24, 4  ;;  %s58_s27 = sshll.u32 %s6246_s26, 4  ;;  %s37_s25 = int_to_ptr.vmem [resolvable:$true] %s36_s25  ;;  %s59_s27 = int_to_ptr.vmem [resolvable:$true] %s58_s27 }
   0x5   :  { %s6105_s30 = scalar_lea.hbm %s6507_s2, 192 }
   0x6   :  { %p6106_p0 = scmp.ne.s32.totalorder %s6507_s2, %s6105_s30  ;;  %p6109_p1 = scmp.lt.u32.totalorder %s6105_s30, %s6507_s2 }
   0x8   :  { %p6111_p2 = pnand %p6109_p1, %p6106_p0 }
   0xa   :  { %6114 = shalt.err (!%p6111_p2)
}
   0xb   :  { %s6115_s12 = scalar_lea.vmem %s37_s25, 192  ;;  %p6120_p4 = scmp.lt.s32.totalorder %s37_s25, %s37_s25 }
   0xc   :  { %p6116_p3 = scmp.ne.s32.totalorder %s37_s25, %s6115_s12  ;;  %p6121_p5 = scmp.lt.s32.totalorder %s6115_s12, %s6115_s12 }
   0xe   :  { %p6122_p6 = por %p6121_p5, %p6120_p4 }
  0x10   :  { %p6123_p7 = pnand %p6122_p6, %p6116_p3 }
  0x12   :  { %6126 = shalt.err (!%p6123_p7)
}
  0x13   :  { %39 = dma.hbm_to_vmem [thread:$0]  %s6507_s2, 192, %s37_s25, [#allocation5]  }
  0x14   :  { %s6127_s17 = scalar_lea.hbm %s6509_s4, 192 }
  0x15   :  { %p6128_p8 = scmp.ne.s32.totalorder %s6509_s4, %s6127_s17  ;;  %p6131_p9 = scmp.lt.u32.totalorder %s6127_s17, %s6509_s4 }
  0x17   :  { %p6133_p10 = pnand %p6131_p9, %p6128_p8 }
  0x19   :  { %6136 = shalt.err (!%p6133_p10)
}
  0x1a   :  { %s6137_s22 = scalar_lea.vmem %s59_s27, 192  ;;  %p6142_p12 = scmp.lt.s32.totalorder %s59_s27, %s59_s27 }
  0x1b   :  { %p6138_p11 = scmp.ne.s32.totalorder %s59_s27, %s6137_s22  ;;  %p6143_p13 = scmp.lt.s32.totalorder %s6137_s22, %s6137_s22 }
  0x1d   :  { %p6144_p0 = por %p6143_p13, %p6142_p12 }
  0x1f   :  { %p6145_p1 = pnand %p6144_p0, %p6138_p11 }
  0x21   :  { %6148 = shalt.err (!%p6145_p1)
}
  0x22   :  { %61 = dma.hbm_to_vmem [thread:$0]  %s6509_s4, 192, %s59_s27, [#allocation8]  }
  0x23   :  { %s6247_s24 = smov [#allocation2]   ;;  %s6149_s29 = scalar_lea.hbm %s6506_s1, 5376 }
  0x24   :  { %s23_s25 = sshll.u32 %s6247_s24, 4  ;;  %p6150_p2 = scmp.ne.s32.totalorder %s6506_s1, %s6149_s29  ;;  %s24_s25 = int_to_ptr.vmem [resolvable:$true] %s23_s25 }
  0x25   :  { %p6153_p3 = scmp.lt.u32.totalorder %s6149_s29, %s6506_s1 }
  0x27   :  { %p6155_p4 = pnand %p6153_p3, %p6150_p2 }
  0x29   :  { %6158 = shalt.err (!%p6155_p4)
}
  0x2a   :  { %s6159_s11 = scalar_lea.vmem %s24_s25, 5376  ;;  %p6164_p6 = scmp.lt.s32.totalorder %s24_s25, %s24_s25 }
  0x2b   :  { %p6160_p5 = scmp.ne.s32.totalorder %s24_s25, %s6159_s11  ;;  %p6165_p7 = scmp.lt.s32.totalorder %s6159_s11, %s6159_s11 }
  0x2d   :  { %p6166_p8 = por %p6165_p7, %p6164_p6 }
  0x2f   :  { %p6167_p9 = pnand %p6166_p8, %p6160_p5 }
  0x31   :  { %6170 = shalt.err (!%p6167_p9)
}
  0x32   :  { %s6248_s4 = smov 768   ;;  %s6249_s27 = smov 48  }
  0x33   :  { %29 = dma.hbm_to_vmem [thread:$0]  %s6506_s1, 5376, %s24_s25, [#allocation3], %s6248_s4, %s6248_s4, %s6249_s27  }
  0x34   :  { %s6250_s14 = smov [#allocation6]   ;;  %s6171_s18 = scalar_lea.hbm %s6508_s3, 49152 }
  0x35   :  { %s45_s15 = sshll.u32 %s6250_s14, 4  ;;  %p6172_p10 = scmp.ne.s32.totalorder %s6508_s3, %s6171_s18  ;;  %s46_s15 = int_to_ptr.vmem [resolvable:$true] %s45_s15 }
  0x36   :  { %p6175_p11 = scmp.lt.u32.totalorder %s6171_s18, %s6508_s3 }
  0x38   :  { %p6177_p12 = pnand %p6175_p11, %p6172_p10 }
  0x3a   :  { %6180 = shalt.err (!%p6177_p12)
}
  0x3b   :  { %s6181_s2 = scalar_lea.vmem %s46_s15, 49152  ;;  %p6186_p0 = scmp.lt.s32.totalorder %s46_s15, %s46_s15 }
  0x3c   :  { %p6182_p13 = scmp.ne.s32.totalorder %s46_s15, %s6181_s2  ;;  %p6187_p1 = scmp.lt.s32.totalorder %s6181_s2, %s6181_s2 }
  0x3e   :  { %p6188_p2 = por %p6187_p1, %p6186_p0 }
  0x40   :  { %p6189_p3 = pnand %p6188_p2, %p6182_p13 }
  0x42   :  { %6192 = shalt.err (!%p6189_p3)
}
  0x43   :  { %s6251_s1 = smov 256   ;;  %s6252_s23 = smov 16  }
  0x44   :  { %51 = dma.hbm_to_vmem [thread:$0]  %s6508_s3, 49152, %s46_s15, [#allocation5], %s6251_s1, %s6251_s1, %s6252_s23  }
  0x45   :  { %s6253_s26 = smov [#allocation9]   ;;  %s6193_s8 = scalar_lea.hbm %s6510_s5, 12288 }
  0x46   :  { %s67_s28 = sshll.u32 %s6253_s26, 4  ;;  %p6194_p4 = scmp.ne.s32.totalorder %s6510_s5, %s6193_s8  ;;  %s68_s28 = int_to_ptr.vmem [resolvable:$true] %s67_s28 }
  0x47   :  { %p6197_p5 = scmp.lt.u32.totalorder %s6193_s8, %s6510_s5 }
  0x49   :  { %p6199_p6 = pnand %p6197_p5, %p6194_p4 }
  0x4b   :  { %6202 = shalt.err (!%p6199_p6)
}
  0x4c   :  { %s6203_s27 = scalar_lea.vmem %s68_s28, 12288  ;;  %p6208_p8 = scmp.lt.s32.totalorder %s68_s28, %s68_s28 }
  0x4d   :  { %p6204_p7 = scmp.ne.s32.totalorder %s68_s28, %s6203_s27  ;;  %p6209_p9 = scmp.lt.s32.totalorder %s6203_s27, %s6203_s27 }
  0x4f   :  { %p6210_p10 = por %p6209_p9, %p6208_p8 }
  0x51   :  { %p6211_p11 = pnand %p6210_p10, %p6204_p7 }
  0x53   :  { %6214 = shalt.err (!%p6211_p11)
}
  0x54   :  { %s6254_s3 = smov 64   ;;  %s6255_s12 = smov 4  }
  0x55   :  { %73 = dma.hbm_to_vmem [thread:$0]  %s6510_s5, 12288, %s68_s28, [#allocation8], %s6254_s3, %s6254_s3, %s6255_s12  }
  0x56   :  { %s6256_s15 = smov [#allocation10]   ;;  %s6215_s19 = scalar_lea.hbm %s6511_s6, 16 }
  0x57   :  { %s80_s16 = sshll.u32 %s6256_s15, 4  ;;  %p6216_p12 = scmp.ne.s32.totalorder %s6511_s6, %s6215_s19  ;;  %s81_s16 = int_to_ptr.vmem [resolvable:$true] %s80_s16 }
  0x58   :  { %p6219_p13 = scmp.lt.u32.totalorder %s6215_s19, %s6511_s6 }
  0x5a   :  { %p6221_p0 = pnand %p6219_p13, %p6216_p12 }
  0x5c   :  { %6224 = shalt.err (!%p6221_p0)
}
  0x5d   :  { %s6225_s1 = scalar_lea.vmem %s81_s16, 16  ;;  %s6229_s5 = scalar_lea.vmem %s81_s16, 32 }
  0x5e   :  { %p6226_p1 = scmp.ne.s32.totalorder %s81_s16, %s6225_s1  ;;  %p6230_p2 = scmp.lt.s32.totalorder %s81_s16, %s81_s16 }
  0x5f   :  { %p6231_p3 = scmp.lt.s32.totalorder %s6229_s5, %s6225_s1 }
  0x61   :  { %p6232_p4 = por %p6231_p3, %p6230_p2 }
  0x63   :  { %p6233_p5 = pnand %p6232_p4, %p6226_p1 }
  0x65   :  { %6236 = shalt.err (!%p6233_p5)
}
  0x66   :  { %83 = dma.hbm_to_vmem [thread:$0]  %s6511_s6, 16, %s81_s16, [#allocation11]  }
  0x67   :  { %6237 = dma.done.wait [#allocation3], 5376  }
  0x68   :  { %6238 = vsyncadd [#allocation3], 4294961920 }
  0x69   :  { %6239 = dma.done.wait [#allocation5], 49344  }
  0x6a   :  { %6240 = vsyncadd [#allocation5], 4294917952 }
  0x6b   :  { %6241 = dma.done.wait [#allocation8], 12480  }
  0x6c   :  { %6242 = vsyncadd [#allocation8], 4294954816 }
  0x6d   :  { %6243 = dma.done.wait [#allocation11], 16  }
  0x6e   :  { %6244 = vsyncadd [#allocation11], 4294967280  ;;  %v6257_v0 = vmov 0   ;;  %v5365_v1 = vld [vmem:[#allocation2 + $0x4] ss:$48 sps:$4 sm:$0xff]   ;;  %vm424_vm0 = vcmask 1043456  }
  0x6f   :  { %493 = vmatprep.mubr.bf16.mxu0 %v6257_v0  ;;  %534 = vmatprep.mubr.bf16.mxu1 %v6257_v0  ;;  %v5367_v2 = vld [vmem:[#allocation2] ss:$48 sps:$4 sm:$0xff]   ;;  %v5368_v3 = vld [vmem:[#allocation2 + $0x64] ss:$48 sps:$4 sm:$0xff]   ;;  %v5376_v7 = vld [vmem:[#allocation2 + $0xc] ss:$48 sps:$4 sm:$0xff]  }
  0x70   :  { %461 = vmatprep.subr.bf16.mxu0 %v5365_v1  ;;  %v5370_v4 = vld [vmem:[#allocation2 + $0x60] ss:$48 sps:$4 sm:$0xff]   ;;  %v5371_v5 = vld [vmem:[#allocation2 + $0xc4] ss:$48 sps:$4 sm:$0xff]   ;;  %v5378_v8 = vld [vmem:[#allocation2 + $0x8] ss:$48 sps:$4 sm:$0xff]   ;;  %502 = vmatprep.subr.bf16.mxu1 %v5376_v7 }
  0x71   :  { %462 = vmatpush1.bf16.msra.mxu0 %v5367_v2  ;;  %v140_v6 = vld [vmem:[#allocation2 + $0x120] sm:$0xff]  ;;  %v5379_v9 = vld [vmem:[#allocation2 + $0x6c] ss:$48 sps:$4 sm:$0xff]   ;;  %503 = vmatpush1.bf16.msra.mxu1 %v5378_v8  ;;  %v5381_v13 = vld [vmem:[#allocation2 + $0x68] ss:$48 sps:$4 sm:$0xff]   ;;  %vm420_vm1 = vcmask 457728  }
  0x72   :  { %463 = vmatprep.subr.bf16.mxu0 %v5368_v3  ;;  %v5373_v10 = vld [vmem:[#allocation2 + $0xc0] ss:$48 sps:$4 sm:$0xff]   ;;  %v4680_v11 = vcombine.high %v140_v6, %v140_v6  ;;  %v4679_v12 = vcombine.low %v140_v6, %v140_v6  ;;  %504 = vmatprep.subr.bf16.mxu1 %v5379_v9  ;;  %v5382_v14 = vld [vmem:[#allocation2 + $0xcc] ss:$48 sps:$4 sm:$0xff]   ;;  %v5384_v17 = vld [vmem:[#allocation2 + $0xc8] ss:$48 sps:$4 sm:$0xff]  }
  0x73   :  { %v141_v15 = vld [vmem:[#allocation2 + $0x128] sm:$0xff]  ;;  %v5389_v18 = vld [vmem:[#allocation2 + $0x14] ss:$48 sps:$4 sm:$0xff]   ;;  %v6377_v21 = vld [vmem:[%s6505_s0] sm:$0xf] }
  0x74   :  { %v426_v16 = vsel %vm424_vm0, %v4679_v12, 0  ;;  %v4682_v19 = vcombine.high %v141_v15, %v141_v15  ;;  %v4681_v20 = vcombine.low %v141_v15, %v141_v15  ;;  %v5387_v22 = vld [vmem:[#allocation2 + $0x10] ss:$48 sps:$4 sm:$0xff]   ;;  %v5392_v23 = vld [vmem:[#allocation2 + $0x74] ss:$48 sps:$4 sm:$0xff]   ;;  %v143_v36 = vld [vmem:[#allocation2 + $0x138] sm:$0xff] }
  0x75   :  { %464 = vmatpush1.bf16.msra.mxu0 %v5370_v4  ;;  %505 = vmatpush1.bf16.msra.mxu1 %v5381_v13  ;;  %v5400_v25 = vld [vmem:[#allocation2 + $0x1c] ss:$48 sps:$4 sm:$0xff]   ;;  %v5390_v26 = vld [vmem:[#allocation2 + $0x70] ss:$48 sps:$4 sm:$0xff]   ;;  %v5395_v27 = vld [vmem:[#allocation2 + $0xd4] ss:$48 sps:$4 sm:$0xff]   ;;  %v4686_v40 = vcombine.high %v143_v36, %v143_v36  ;;  %v4685_v41 = vcombine.low %v143_v36, %v143_v36 }
  0x76   :  { %465 = vmatprep.subr.bf16.mxu0 %v5371_v5  ;;  %506 = vmatprep.subr.bf16.mxu1 %v5382_v14  ;;  %v432_v24 = vsel %vm424_vm0, %v4681_v20, 0  ;;  %v5398_v28 = vld [vmem:[#allocation2 + $0x18] ss:$48 sps:$4 sm:$0xff]   ;;  %v142_v29 = vld [vmem:[#allocation2 + $0x130] sm:$0xff]  ;;  %v5403_v30 = vld [vmem:[#allocation2 + $0x7c] ss:$48 sps:$4 sm:$0xff]  }
  0x77   :  { %v5393_v31 = vld [vmem:[#allocation2 + $0xd0] ss:$48 sps:$4 sm:$0xff]   ;;  %v4684_v32 = vcombine.high %v142_v29, %v142_v29  ;;  %v4683_v33 = vcombine.low %v142_v29, %v142_v29  ;;  %v5401_v34 = vld [vmem:[#allocation2 + $0x78] ss:$48 sps:$4 sm:$0xff]   ;;  %v5406_v35 = vld [vmem:[#allocation2 + $0xdc] ss:$48 sps:$4 sm:$0xff]  }
  0x78   :  { %v5404_v38 = vld [vmem:[#allocation2 + $0xd8] ss:$48 sps:$4 sm:$0xff]   ;;  %v5411_v39 = vld [vmem:[#allocation2 + $0x24] ss:$48 sps:$4 sm:$0xff]   ;;  %v5409_v42 = vld [vmem:[#allocation2 + $0x20] ss:$48 sps:$4 sm:$0xff]  }
  0x79   :  { %466 = vmatpush1.bf16.msra.mxu0 %v5373_v10  ;;  %507 = vmatpush1.bf16.msra.mxu1 %v5384_v17  ;;  %v438_v37 = vsel %vm424_vm0, %v4683_v33, 0  ;;  %v5417_v43 = vld [vmem:[#allocation2 + $0x84] ss:$48 sps:$4 sm:$0xff]   ;;  %v444_v44 = vsel %vm424_vm0, %v4685_v41, 0  ;;  %v5414_v45 = vld [vmem:[#allocation2 + $0x2c] ss:$48 sps:$4 sm:$0xff]  }
  0x7a   :  { %4691 = vmatprep.subr.msk.bf16.mxu0 %vm424_vm0, %v4680_v11  ;;  %4693 = vmatprep.subr.msk.bf16.mxu1 %vm424_vm0, %v4682_v19  ;;  %v5412_v46 = vld [vmem:[#allocation2 + $0x28] ss:$48 sps:$4 sm:$0xff]   ;;  %v5415_v47 = vld [vmem:[#allocation2 + $0x80] ss:$48 sps:$4 sm:$0xff]   ;;  %v5420_v48 = vld [vmem:[#allocation2 + $0x8c] ss:$48 sps:$4 sm:$0xff]  }
  0x7b   :  { %v5423_v49 = vld [vmem:[#allocation2 + $0xe4] ss:$48 sps:$4 sm:$0xff]   ;;  %v5421_v51 = vld [vmem:[#allocation2 + $0xe0] ss:$48 sps:$4 sm:$0xff]   ;;  %v5418_v52 = vld [vmem:[#allocation2 + $0x88] ss:$48 sps:$4 sm:$0xff]  }
  0x7c   :  { %v144_v50 = vld [vmem:[#allocation2 + $0x140] sm:$0xff]  ;;  %v5426_v55 = vld [vmem:[#allocation2 + $0xec] ss:$48 sps:$4 sm:$0xff]   ;;  %v5424_v57 = vld [vmem:[#allocation2 + $0xe8] ss:$48 sps:$4 sm:$0xff]  }
  0x7d   :  { %468 = vmatpush1.bf16.msra.mxu0 %v426_v16  ;;  %509 = vmatpush1.bf16.msra.mxu1 %v432_v24  ;;  %v4688_v53 = vcombine.high %v144_v50, %v144_v50  ;;  %v4687_v54 = vcombine.low %v144_v50, %v144_v50  ;;  %v145_v56 = vld [vmem:[#allocation2 + $0x148] sm:$0xff]  ;;  %v5433_v59 = vld [vmem:[#allocation6 + $0x4] ss:$16 sps:$4 sm:$0xff]   ;;  %v5434_v3 = vld [vmem:[#allocation6 + $0x8] ss:$16 sps:$4 sm:$0xff]  }
  0x7e   :  { %543 = vmatprep.subr.bf16.mxu0 %v5389_v18  ;;  %584 = vmatprep.subr.bf16.mxu1 %v5400_v25  ;;  %v4690_v60 = vcombine.high %v145_v56, %v145_v56  ;;  %v4689_v61 = vcombine.low %v145_v56, %v145_v56  ;;  %v5431_v62 = vld [vmem:[#allocation6] ss:$16 sps:$4 sm:$0xff]   ;;  %v5439_v63 = vld [vmem:[#allocation6 + $0x24] ss:$16 sps:$4 sm:$0xff]   ;;  %v5436_v1 = vld [vmem:[#allocation6 + $0xc] ss:$16 sps:$4 sm:$0xff]  }
  0x7f   :  { %v450_v58 = vsel %vm424_vm0, %v4687_v54, 0  ;;  %v5437_v2 = vld [vmem:[#allocation6 + $0x20] ss:$16 sps:$4 sm:$0xff]   ;;  %v5445_v4 = vld [vmem:[#allocation6 + $0x44] ss:$16 sps:$4 sm:$0xff]  }
  0x80   :  { %4692 = vmatmul.mubr.msk.bf16.vlgmr.msra.gmra.mrb[0].mxu0 %vm420_vm1, %v6377_v21  ;;  %4694 = vmatmul.mubr.msk.bf16.vlgmr.msra.gmra.mrb[0].mxu1 %vm420_vm1, %v6377_v21  ;;  %v5442_v5 = vld [vmem:[#allocation6 + $0x2c] ss:$16 sps:$4 sm:$0xff]   ;;  %v5443_v6 = vld [vmem:[#allocation6 + $0x40] ss:$16 sps:$4 sm:$0xff]   ;;  %v5440_v7 = vld [vmem:[#allocation6 + $0x28] ss:$16 sps:$4 sm:$0xff]  }
  0x81   :  { %544 = vmatpush1.bf16.msra.mxu0 %v5387_v22  ;;  %575 = vmatprep.mubr.bf16.mxu0 %v6257_v0  ;;  %v5451_v8 = vld [vmem:[#allocation6 + $0x64] ss:$16 sps:$4 sm:$0xff]   ;;  %v5448_v9 = vld [vmem:[#allocation6 + $0x4c] ss:$16 sps:$4 sm:$0xff]   ;;  %v5449_v10 = vld [vmem:[#allocation6 + $0x60] ss:$16 sps:$4 sm:$0xff]  }
  0x82   :  { %545 = vmatprep.subr.bf16.mxu0 %v5392_v23  ;;  %585 = vmatpush1.bf16.msra.mxu1 %v5398_v28  ;;  %v5446_v11 = vld [vmem:[#allocation6 + $0x48] ss:$16 sps:$4 sm:$0xff]   ;;  %v5457_v12 = vld [vmem:[#allocation6 + $0x84] ss:$16 sps:$4 sm:$0xff]   ;;  %v5454_v13 = vld [vmem:[#allocation6 + $0x6c] ss:$16 sps:$4 sm:$0xff]  }
  0x83   :  { %586 = vmatprep.subr.bf16.mxu1 %v5403_v30  ;;  %616 = vmatprep.mubr.bf16.mxu1 %v6257_v0  ;;  %v5452_v14 = vld [vmem:[#allocation6 + $0x68] ss:$16 sps:$4 sm:$0xff]   ;;  %v5455_v15 = vld [vmem:[#allocation6 + $0x80] ss:$16 sps:$4 sm:$0xff]   ;;  %v5460_v16 = vld [vmem:[#allocation6 + $0x8c] ss:$16 sps:$4 sm:$0xff]  }
  0x84   :  { %v5463_v17 = vld [vmem:[#allocation6 + $0xa4] ss:$16 sps:$4 sm:$0xff]   ;;  %v5461_v18 = vld [vmem:[#allocation6 + $0xa0] ss:$16 sps:$4 sm:$0xff]   ;;  %v5458_v19 = vld [vmem:[#allocation6 + $0x88] ss:$16 sps:$4 sm:$0xff]  }
  0x85   :  { %546 = vmatpush1.bf16.msra.mxu0 %v5390_v26  ;;  %v5469_v20 = vld [vmem:[#allocation6 + $0xc4] ss:$16 sps:$4 sm:$0xff]   ;;  %v5467_v22 = vld [vmem:[#allocation6 + $0xc0] ss:$16 sps:$4 sm:$0xff]   ;;  %v5464_v23 = vld [vmem:[#allocation6 + $0xa8] ss:$16 sps:$4 sm:$0xff]  }
  0x86   :  { %547 = vmatprep.subr.bf16.mxu0 %v5395_v27  ;;  %587 = vmatpush1.bf16.msra.mxu1 %v5401_v34  ;;  %v5475_v24 = vld [vmem:[#allocation6 + $0xe4] ss:$16 sps:$4 sm:$0xff]   ;;  %v5472_v25 = vld [vmem:[#allocation6 + $0xcc] ss:$16 sps:$4 sm:$0xff]   ;;  %v5473_v26 = vld [vmem:[#allocation6 + $0xe0] ss:$16 sps:$4 sm:$0xff]  }
  0x87   :  { %588 = vmatprep.subr.bf16.mxu1 %v5406_v35  ;;  %v5470_v27 = vld [vmem:[#allocation6 + $0xc8] ss:$16 sps:$4 sm:$0xff]   ;;  %v5481_v28 = vld [vmem:[#allocation6 + $0x104] ss:$16 sps:$4 sm:$0xff]   ;;  %v5478_v29 = vld [vmem:[#allocation6 + $0xec] ss:$16 sps:$4 sm:$0xff]  }
  0x88   :  { %v5479_v30 = vld [vmem:[#allocation6 + $0x100] ss:$16 sps:$4 sm:$0xff]   ;;  %v5484_v33 = vld [vmem:[#allocation6 + $0x10c] ss:$16 sps:$4 sm:$0xff]   ;;  %v5482_v35 = vld [vmem:[#allocation6 + $0x108] ss:$16 sps:$4 sm:$0xff]  }
  0x89   :  { %548 = vmatpush1.bf16.msra.mxu0 %v5393_v31  ;;  %v5476_v31 = vld [vmem:[#allocation6 + $0xe8] ss:$16 sps:$4 sm:$0xff]   ;;  %v5485_v34 = vld [vmem:[#allocation6 + $0x120] ss:$16 sps:$4 sm:$0xff]   ;;  %v5493_v36 = vld [vmem:[#allocation6 + $0x144] ss:$16 sps:$4 sm:$0xff]  }
  0x8a   :  { %4695 = vmatprep.subr.msk.bf16.mxu0 %vm424_vm0, %v4684_v32  ;;  %589 = vmatpush1.bf16.msra.mxu1 %v5404_v38  ;;  %v5487_v32 = vld [vmem:[#allocation6 + $0x124] ss:$16 sps:$4 sm:$0xff]   ;;  %v5491_v38 = vld [vmem:[#allocation6 + $0x140] ss:$16 sps:$4 sm:$0xff]   ;;  %v5496_v41 = vld [vmem:[#allocation6 + $0x14c] ss:$16 sps:$4 sm:$0xff]  }
  0x8b   :  { %4697 = vmatprep.subr.msk.bf16.mxu1 %vm424_vm0, %v4686_v40  ;;  %v5499_v40 = vld [vmem:[#allocation6 + $0x164] ss:$16 sps:$4 sm:$0xff]   ;;  %v5506_v50 = vld [vmem:[#allocation6 + $0x188] ss:$16 sps:$4 sm:$0xff]   ;;  %v5520_v56 = vld [vmem:[#allocation6 + $0x1cc] ss:$16 sps:$4 sm:$0xff]  }
  0x8c   :  { %v5512_v54 = vld [vmem:[#allocation6 + $0x1a8] ss:$16 sps:$4 sm:$0xff]  }
  0x8d   :  { %550 = vmatpush1.bf16.msra.mxu0 %v438_v37  ;;  %v5490_v37 = vld [vmem:[#allocation6 + $0x12c] ss:$16 sps:$4 sm:$0xff]  }
  0x8e   :  { %625 = vmatprep.subr.bf16.mxu0 %v5411_v39  ;;  %591 = vmatpush1.bf16.msra.mxu1 %v444_v44  ;;  %v5488_v39 = vld [vmem:[#allocation6 + $0x128] ss:$16 sps:$4 sm:$0xff]   ;;  %v5505_v44 = vld [vmem:[#allocation6 + $0x184] ss:$16 sps:$4 sm:$0xff]  }
  0x8f   :  { %666 = vmatprep.subr.bf16.mxu1 %v5414_v45  ;;  %v5502_v45 = vld [vmem:[#allocation6 + $0x16c] ss:$16 sps:$4 sm:$0xff]  }
  0x90   :  { %4696 = vmatmul.mubr.msk.bf16.vlgmr.msra.gmra.mrb[4].mxu0 %vm420_vm1, %v6377_v21 }
  0x91   :  { %626 = vmatpush1.bf16.msra.mxu0 %v5409_v42  ;;  %657 = vmatprep.mubr.bf16.mxu0 %v6257_v0  ;;  %v5497_v42 = vld [vmem:[#allocation6 + $0x160] ss:$16 sps:$4 sm:$0xff]  }
  0x92   :  { %627 = vmatprep.subr.bf16.mxu0 %v5417_v43  ;;  %4698 = vmatmul.mubr.msk.bf16.vlgmr.msra.gmra.mrb[4].mxu1 %vm420_vm1, %v6377_v21  ;;  %v5494_v43 = vld [vmem:[#allocation6 + $0x148] ss:$16 sps:$4 sm:$0xff]  }
  0x93   :  { %667 = vmatpush1.bf16.msra.mxu1 %v5412_v46  ;;  %698 = vmatprep.mubr.bf16.mxu1 %v6257_v0  ;;  %v456_v0 = vsel %vm424_vm0, %v4689_v61, 0  ;;  %v5503_v46 = vld [vmem:[#allocation6 + $0x180] ss:$16 sps:$4 sm:$0xff]   ;;  %v5529_v61 = vld [vmem:[#allocation6 + $0x204] ss:$16 sps:$4 sm:$0xff]  }
  0x94   :  { %668 = vmatprep.subr.bf16.mxu1 %v5420_v48  ;;  %v5511_v48 = vld [vmem:[#allocation6 + $0x1a4] ss:$16 sps:$4 sm:$0xff]  }
  0x95   :  { %628 = vmatpush1.bf16.msra.mxu0 %v5415_v47  ;;  %v5500_v47 = vld [vmem:[#allocation6 + $0x168] ss:$16 sps:$4 sm:$0xff]  }
  0x96   :  { %629 = vmatprep.subr.bf16.mxu0 %v5423_v49  ;;  %v5508_v49 = vld [vmem:[#allocation6 + $0x18c] ss:$16 sps:$4 sm:$0xff]  }
  0x97   :  { %669 = vmatpush1.bf16.msra.mxu1 %v5418_v52  ;;  %v5514_v52 = vld [vmem:[#allocation6 + $0x1ac] ss:$16 sps:$4 sm:$0xff]  }
  0x98   :  { %670 = vmatprep.subr.bf16.mxu1 %v5426_v55  ;;  %v5515_v55 = vld [vmem:[#allocation6 + $0x1c0] ss:$16 sps:$4 sm:$0xff]  }
  0x99   :  { %630 = vmatpush1.bf16.msra.mxu0 %v5421_v51  ;;  %v5509_v51 = vld [vmem:[#allocation6 + $0x1a0] ss:$16 sps:$4 sm:$0xff]  }
  0x9a   :  { %4699 = vmatprep.subr.msk.bf16.mxu0 %vm424_vm0, %v4688_v53  ;;  %v5517_v53 = vld [vmem:[#allocation6 + $0x1c4] ss:$16 sps:$4 sm:$0xff]  }
  0x9b   :  { %671 = vmatpush1.bf16.msra.mxu1 %v5424_v57  ;;  %v5523_v57 = vld [vmem:[#allocation6 + $0x1e4] ss:$16 sps:$4 sm:$0xff]  }
  0x9c   :  { %4701 = vmatprep.subr.msk.bf16.mxu1 %vm424_vm0, %v4690_v60  ;;  %v5526_v60 = vld [vmem:[#allocation6 + $0x1ec] ss:$16 sps:$4 sm:$0xff]  }
  0x9d   :  { %632 = vmatpush1.bf16.msra.mxu0 %v450_v58  ;;  %v5518_v58 = vld [vmem:[#allocation6 + $0x1c8] ss:$16 sps:$4 sm:$0xff]  }
  0x9e   :  { %1521 = vmatprep.subr.bf16.mxu0 %v5433_v59  ;;  %v5521_v59 = vld [vmem:[#allocation6 + $0x1e0] ss:$16 sps:$4 sm:$0xff]  }
  0x9f   :  { %673 = vmatpush1.bf16.msra.mxu1 %v456_v0  ;;  %v150_v0 = vlaneseq }
  0xa0   :  { %4700 = vmatmul.mubr.msk.bf16.vlgmr.msra.gmra.mrb[8].mxu0 %vm420_vm1, %v6377_v21  ;;  %1603 = vmatprep.subr.bf16.mxu1 %v5436_v1 }
  0xa1   :  { %1522 = vmatpush1.bf16.msra.mxu0 %v5431_v62  ;;  %v5524_v62 = vld [vmem:[#allocation6 + $0x1e8] ss:$16 sps:$4 sm:$0xff]   ;;  %v6405_v1 = vshrl.u32 %v150_v0, 7 }
  0xa2   :  { %1523 = vmatprep.subr.bf16.mxu0 %v5439_v63  ;;  %4702 = vmatmul.mubr.msk.bf16.vlgmr.msra.gmra.mrb[8].mxu1 %vm420_vm1, %v6377_v21  ;;  %v5466_v21 = vld [vmem:[#allocation6 + $0xac] ss:$16 sps:$4 sm:$0xff]  }
  0xa3   :  { %1604 = vmatpush1.bf16.msra.mxu1 %v5434_v3  ;;  %v5532_v63 = vld [vmem:[#allocation6 + $0x20c] ss:$16 sps:$4 sm:$0xff]   ;;  %v6410_v3 = vld [vmem:[#allocation4] sm:$0xff] }
  0xa4   :  { %1605 = vmatprep.subr.bf16.mxu1 %v5442_v5 }
  0xa5   :  { %1524 = vmatpush1.bf16.msra.mxu0 %v5437_v2  ;;  %v6408_v2 = vsub.s32 0, %v6405_v1 }
  0xa6   :  { %1525 = vmatprep.subr.bf16.mxu0 %v5445_v4  ;;  %v6413_v4 = vsub.s32 1, %v6405_v1 }
  0xa7   :  { %1606 = vmatpush1.bf16.msra.mxu1 %v5440_v7  ;;  %v153_v5 = vrot.slane %v6410_v3, %v6408_v2  ;;  %v6420_v7 = vsub.s32 3, %v6405_v1 }
  0xa8   :  { %1607 = vmatprep.subr.bf16.mxu1 %v5448_v9 }
  0xa9   :  { %1526 = vmatpush1.bf16.msra.mxu0 %v5443_v6  ;;  %v157_v6 = vrot.slane %v6410_v3, %v6413_v4 }
  0xaa   :  { %1527 = vmatprep.subr.bf16.mxu0 %v5451_v8 }
  0xab   :  { %1608 = vmatpush1.bf16.msra.mxu1 %v5446_v11 }
  0xac   :  { %1609 = vmatprep.subr.bf16.mxu1 %v5454_v13 }
  0xad   :  { %1528 = vmatpush1.bf16.msra.mxu0 %v5449_v10 }
  0xae   :  { %1529 = vmatprep.subr.bf16.mxu0 %v5457_v12 }
  0xaf   :  { %1610 = vmatpush1.bf16.msra.mxu1 %v5452_v14 }
  0xb0   :  { %1611 = vmatprep.subr.bf16.mxu1 %v5460_v16 }
  0xb1   :  { %1530 = vmatpush1.bf16.msra.mxu0 %v5455_v15  ;;  %v165_v15 = vrot.slane %v6410_v3, %v6420_v7 }
  0xb2   :  { %1531 = vmatprep.subr.bf16.mxu0 %v5463_v17  ;;  %v5527_v17 = vld [vmem:[#allocation6 + $0x200] ss:$16 sps:$4 sm:$0xff]  }
  0xb3   :  { %1612 = vmatpush1.bf16.msra.mxu1 %v5458_v19 }
  0xb4   :  { %1613 = vmatprep.subr.bf16.mxu1 %v5466_v21 }
  0xb5   :  { %1532 = vmatpush1.bf16.msra.mxu0 %v5461_v18  ;;  %v5530_v18 = vld [vmem:[#allocation6 + $0x208] ss:$16 sps:$4 sm:$0xff]  }
  0xb6   :  { %1533 = vmatprep.subr.bf16.mxu0 %v5469_v20 }
  0xb7   :  { %1614 = vmatpush1.bf16.msra.mxu1 %v5464_v23  ;;  %v5535_v23 = vld [vmem:[#allocation6 + $0x224] ss:$16 sps:$4 sm:$0xff]  }
  0xb8   :  { %1615 = vmatprep.subr.bf16.mxu1 %v5472_v25 }
  0xb9   :  { %1534 = vmatpush1.bf16.msra.mxu0 %v5467_v22 }
  0xba   :  { %1535 = vmatprep.subr.bf16.mxu0 %v5475_v24  ;;  %v5538_v24 = vld [vmem:[#allocation6 + $0x22c] ss:$16 sps:$4 sm:$0xff]  }
  0xbb   :  { %1616 = vmatpush1.bf16.msra.mxu1 %v5470_v27 }
  0xbc   :  { %1617 = vmatprep.subr.bf16.mxu1 %v5478_v29  ;;  %v5533_v29 = vld [vmem:[#allocation6 + $0x220] ss:$16 sps:$4 sm:$0xff]  }
  0xbd   :  { %1536 = vmatpush1.bf16.msra.mxu0 %v5473_v26 }
  0xbe   :  { %1537 = vmatprep.subr.bf16.mxu0 %v5481_v28 }
  0xbf   :  { %1618 = vmatpush1.bf16.msra.mxu1 %v5476_v31  ;;  %v5541_v31 = vld [vmem:[#allocation6 + $0x244] ss:$16 sps:$4 sm:$0xff]  }
  0xc0   :  { %1619 = vmatprep.subr.bf16.mxu1 %v5484_v33 }
  0xc1   :  { %1538 = vmatpush1.bf16.msra.mxu0 %v5479_v30  ;;  %v5536_v30 = vld [vmem:[#allocation6 + $0x228] ss:$16 sps:$4 sm:$0xff]  }
  0xc2   :  { %1539 = vmatprep.subr.bf16.mxu0 %v5487_v32  ;;  %v5544_v32 = vld [vmem:[#allocation6 + $0x24c] ss:$16 sps:$4 sm:$0xff]  }
  0xc3   :  { %1620 = vmatpush1.bf16.msra.mxu1 %v5482_v35  ;;  %v5542_v35 = vld [vmem:[#allocation6 + $0x248] ss:$16 sps:$4 sm:$0xff]  }
  0xc4   :  { %1621 = vmatprep.subr.bf16.mxu1 %v5490_v37  ;;  %v5550_v37 = vld [vmem:[#allocation6 + $0x26c] ss:$16 sps:$4 sm:$0xff]  }
  0xc5   :  { %1540 = vmatpush1.bf16.msra.mxu0 %v5485_v34  ;;  %v5539_v34 = vld [vmem:[#allocation6 + $0x240] ss:$16 sps:$4 sm:$0xff]  }
  0xc6   :  { %1541 = vmatprep.subr.bf16.mxu0 %v5493_v36  ;;  %v5547_v36 = vld [vmem:[#allocation6 + $0x264] ss:$16 sps:$4 sm:$0xff]  }
  0xc7   :  { %1622 = vmatpush1.bf16.msra.mxu1 %v5488_v39 }
  0xc8   :  { %1623 = vmatprep.subr.bf16.mxu1 %v5496_v41  ;;  %v5548_v41 = vld [vmem:[#allocation6 + $0x268] ss:$16 sps:$4 sm:$0xff]  }
  0xc9   :  { %1542 = vmatpush1.bf16.msra.mxu0 %v5491_v38 }
  0xca   :  { %1543 = vmatprep.subr.bf16.mxu0 %v5499_v40  ;;  %v5545_v40 = vld [vmem:[#allocation6 + $0x260] ss:$16 sps:$4 sm:$0xff]  }
  0xcb   :  { %1624 = vmatpush1.bf16.msra.mxu1 %v5494_v43  ;;  %v5553_v43 = vld [vmem:[#allocation6 + $0x284] ss:$16 sps:$4 sm:$0xff]  }
  0xcc   :  { %1625 = vmatprep.subr.bf16.mxu1 %v5502_v45 }
  0xcd   :  { %1544 = vmatpush1.bf16.msra.mxu0 %v5497_v42 }
  0xce   :  { %1545 = vmatprep.subr.bf16.mxu0 %v5505_v44  ;;  %v5556_v44 = vld [vmem:[#allocation6 + $0x28c] ss:$16 sps:$4 sm:$0xff]  }
  0xcf   :  { %1626 = vmatpush1.bf16.msra.mxu1 %v5500_v47  ;;  %v5551_v47 = vld [vmem:[#allocation6 + $0x280] ss:$16 sps:$4 sm:$0xff]  }
  0xd0   :  { %1627 = vmatprep.subr.bf16.mxu1 %v5508_v49 }
  0xd1   :  { %1546 = vmatpush1.bf16.msra.mxu0 %v5503_v46 }
  0xd2   :  { %1547 = vmatprep.subr.bf16.mxu0 %v5511_v48  ;;  %v5554_v48 = vld [vmem:[#allocation6 + $0x288] ss:$16 sps:$4 sm:$0xff]  }
  0xd3   :  { %1628 = vmatpush1.bf16.msra.mxu1 %v5506_v50  ;;  %v5559_v50 = vld [vmem:[#allocation6 + $0x2a4] ss:$16 sps:$4 sm:$0xff]  }
  0xd4   :  { %1629 = vmatprep.subr.bf16.mxu1 %v5514_v52 }
  0xd5   :  { %1548 = vmatpush1.bf16.msra.mxu0 %v5509_v51  ;;  %v5562_v51 = vld [vmem:[#allocation6 + $0x2ac] ss:$16 sps:$4 sm:$0xff]  }
  0xd6   :  { %1549 = vmatprep.subr.bf16.mxu0 %v5517_v53 }
  0xd7   :  { %1630 = vmatpush1.bf16.msra.mxu1 %v5512_v54  ;;  %v5557_v54 = vld [vmem:[#allocation6 + $0x2a0] ss:$16 sps:$4 sm:$0xff]  }
  0xd8   :  { %1631 = vmatprep.subr.bf16.mxu1 %v5520_v56  ;;  %v5565_v56 = vld [vmem:[#allocation6 + $0x2c4] ss:$16 sps:$4 sm:$0xff]  }
  0xd9   :  { %1550 = vmatpush1.bf16.msra.mxu0 %v5515_v55  ;;  %v5560_v55 = vld [vmem:[#allocation6 + $0x2a8] ss:$16 sps:$4 sm:$0xff]  }
  0xda   :  { %1551 = vmatprep.subr.bf16.mxu0 %v5523_v57  ;;  %v5568_v57 = vld [vmem:[#allocation6 + $0x2cc] ss:$16 sps:$4 sm:$0xff]  }
  0xdb   :  { %1632 = vmatpush1.bf16.msra.mxu1 %v5518_v58  ;;  %v5563_v58 = vld [vmem:[#allocation6 + $0x2c0] ss:$16 sps:$4 sm:$0xff]  }
  0xdc   :  { %1633 = vmatprep.subr.bf16.mxu1 %v5526_v60  ;;  %v5571_v60 = vld [vmem:[#allocation6 + $0x2e4] ss:$16 sps:$4 sm:$0xff]  }
  0xdd   :  { %1552 = vmatpush1.bf16.msra.mxu0 %v5521_v59  ;;  %v5566_v59 = vld [vmem:[#allocation6 + $0x2c8] ss:$16 sps:$4 sm:$0xff]  }
  0xde   :  { %1562 = vmatprep.subr.bf16.mxu0 %v5529_v61  ;;  %v5574_v61 = vld [vmem:[#allocation6 + $0x2ec] ss:$16 sps:$4 sm:$0xff]  }
  0xdf   :  { %1634 = vmatpush1.bf16.msra.mxu1 %v5524_v62  ;;  %v6434_v62 = vld [vmem:[#allocation4 + $0x8] sm:$0xf] }
  0xe0   :  { %1644 = vmatprep.subr.bf16.mxu1 %v5532_v63  ;;  %v6437_v63 = vsub.s32 2, %v6405_v1 }
 0x153   :  { %v495_v8 = vpop.f32.mrb[0].mxu0  ;;  %v6424_v19 = vpop.f32.mrb[0].mxu1 }
 0x154   :  { %v496_v9 = vadd.f32 %v495_v8, %v153_v5  ;;  %v497_v10 = vpop.f32.mrb[1].mxu0  ;;  %v538_v21 = vpop.f32.mrb[1].mxu1  ;;  %v5572_v8 = vld [vmem:[#allocation6 + $0x2e8] ss:$16 sps:$4 sm:$0xff]  }
 0x155   :  { %v498_v11 = vadd.f32 %v497_v10, %v157_v6  ;;  %v499_v12 = vpop.f32.mrb[2].mxu0  ;;  %v539_v25 = vadd.f32 %v538_v21, %v165_v15  ;;  %v540_v26 = vpop.f32.mrb[2].mxu1  ;;  %v5569_v6 = vld [vmem:[#allocation6 + $0x2e0] ss:$16 sps:$4 sm:$0xff]   ;;  %v193_v10 = vrot.slane %v6434_v62, %v6437_v63  ;;  %v5583_v21 = vld [vmem:[#allocation6 + $0x324] ss:$16 sps:$4 sm:$0xff]  }
 0x156   :  { %v707_v13 = vmax.f32 %v496_v9, 0.0  ;;  %v500_v14 = vpop.f32.mrb[3].mxu0  ;;  %v541_v27 = vpop.f32.mrb[3].mxu1  ;;  %v5580_v12 = vld [vmem:[#allocation6 + $0x30c] ss:$16 sps:$4 sm:$0xff]  }
 0x157   :  { %v708_v16 = vmax.f32 %v498_v11, 0.0  ;;  %v710_v28 = vmax.f32 %v539_v25, 0.0  ;;  %v5577_v11 = vld [vmem:[#allocation6 + $0x304] ss:$16 sps:$4 sm:$0xff]   ;;  %v197_v14 = vrot.slane %v6434_v62, %v6420_v7  ;;  %v5581_v26 = vld [vmem:[#allocation6 + $0x320] ss:$16 sps:$4 sm:$0xff]  }
 0x158   :  { %v719_v22 = vpack.c.bf16 %v707_v13, %v707_v13  ;;  %v5584_v27 = vld [vmem:[#allocation6 + $0x328] ss:$16 sps:$4 sm:$0xff]  }
 0x159   :  { %v720_v20 = vpack.c.bf16 %v708_v16, %v708_v16  ;;  %v722_v33 = vpack.c.bf16 %v710_v28, %v710_v28  ;;  %v5575_v16 = vld [vmem:[#allocation6 + $0x300] ss:$16 sps:$4 sm:$0xff]   ;;  %v5589_v28 = vld [vmem:[#allocation6 + $0x344] ss:$16 sps:$4 sm:$0xff]  }
 0x15b   :  { %1553 = vmatprep.mubr.bf16.mxu0 %v720_v20  ;;  %1635 = vmatprep.mubr.bf16.mxu1 %v720_v20 }
 0x15c   :  { %1554 = vmatmul.mubr.bf16.vlgmr.msra.gmra.mrb[12].mxu0 %v719_v22  ;;  %1636 = vmatmul.mubr.bf16.vlgmr.msra.gmra.mrb[12].mxu1 %v719_v22  ;;  %v5586_v22 = vld [vmem:[#allocation6 + $0x32c] ss:$16 sps:$4 sm:$0xff]  }
 0x15d   :  { %1563 = vmatpush1.bf16.msra.mxu0 %v5527_v17  ;;  %1645 = vmatpush1.bf16.msra.mxu1 %v5530_v18  ;;  %v5578_v17 = vld [vmem:[#allocation6 + $0x308] ss:$16 sps:$4 sm:$0xff]  }
 0x15e   :  { %1564 = vmatprep.subr.bf16.mxu0 %v5535_v23  ;;  %1646 = vmatprep.subr.bf16.mxu1 %v5538_v24 }
 0x15f   :  { %1594 = vmatprep.mubr.bf16.mxu0 %v722_v33  ;;  %1676 = vmatprep.mubr.bf16.mxu1 %v722_v33  ;;  %v5598_v33 = vld [vmem:[#allocation6 + $0x36c] ss:$16 sps:$4 sm:$0xff]  }
 0x161   :  { %1565 = vmatpush1.bf16.msra.mxu0 %v5533_v29  ;;  %1647 = vmatpush1.bf16.msra.mxu1 %v5536_v30  ;;  %v5592_v29 = vld [vmem:[#allocation6 + $0x34c] ss:$16 sps:$4 sm:$0xff]   ;;  %v5587_v30 = vld [vmem:[#allocation6 + $0x340] ss:$16 sps:$4 sm:$0xff]  }
 0x162   :  { %1566 = vmatprep.subr.bf16.mxu0 %v5541_v31  ;;  %1648 = vmatprep.subr.bf16.mxu1 %v5544_v32  ;;  %v5590_v31 = vld [vmem:[#allocation6 + $0x348] ss:$16 sps:$4 sm:$0xff]   ;;  %v5595_v32 = vld [vmem:[#allocation6 + $0x364] ss:$16 sps:$4 sm:$0xff]  }
 0x163   :  { %v6426_v38 = vpop.f32.mrb[4].mxu0 }
 0x164   :  { %v6428_v39 = vpop.f32.mrb[5].mxu0 }
 0x165   :  { %1567 = vmatpush1.bf16.msra.mxu0 %v5539_v34  ;;  %1649 = vmatpush1.bf16.msra.mxu1 %v5542_v35  ;;  %v581_v42 = vpop.f32.mrb[6].mxu0  ;;  %v6430_v46 = vpop.f32.mrb[4].mxu1  ;;  %v5593_v34 = vld [vmem:[#allocation6 + $0x360] ss:$16 sps:$4 sm:$0xff]   ;;  %v5596_v35 = vld [vmem:[#allocation6 + $0x368] ss:$16 sps:$4 sm:$0xff]  }
 0x166   :  { %1568 = vmatprep.subr.bf16.mxu0 %v5547_v36  ;;  %1650 = vmatprep.subr.bf16.mxu1 %v5550_v37  ;;  %v582_v45 = vpop.f32.mrb[7].mxu0  ;;  %v6432_v49 = vpop.f32.mrb[5].mxu1  ;;  %v5601_v36 = vld [vmem:[#allocation6 + $0x384] ss:$16 sps:$4 sm:$0xff]   ;;  %v5604_v37 = vld [vmem:[#allocation6 + $0x38c] ss:$16 sps:$4 sm:$0xff]  }
 0x167   :  { %v622_v52 = vpop.f32.mrb[6].mxu1  ;;  %v5607_v42 = vld [vmem:[#allocation6 + $0x3a4] ss:$16 sps:$4 sm:$0xff]   ;;  %v172_v45 = vsub.s32 5, %v6405_v1 }
 0x168   :  { %v623_v53 = vpop.f32.mrb[7].mxu1  ;;  %v5616_v52 = vld [vmem:[#allocation6 + $0x3cc] ss:$16 sps:$4 sm:$0xff]  }
 0x169   :  { %1569 = vmatpush1.bf16.msra.mxu0 %v5545_v40  ;;  %1651 = vmatpush1.bf16.msra.mxu1 %v5548_v41  ;;  %v5599_v40 = vld [vmem:[#allocation6 + $0x380] ss:$16 sps:$4 sm:$0xff]   ;;  %v5602_v41 = vld [vmem:[#allocation6 + $0x388] ss:$16 sps:$4 sm:$0xff]   ;;  %v173_v53 = vrot.slane %v6410_v3, %v172_v45  ;;  %v5673_v45 = vld [vmem:[#allocation6 + $0x504] ss:$16 sps:$4 sm:$0xff]  }
 0x16a   :  { %1570 = vmatprep.subr.bf16.mxu0 %v5553_v43  ;;  %1652 = vmatprep.subr.bf16.mxu1 %v5556_v44  ;;  %v5610_v43 = vld [vmem:[#allocation6 + $0x3ac] ss:$16 sps:$4 sm:$0xff]   ;;  %v161_v44 = vrot.slane %v6410_v3, %v6437_v63 }
 0x16d   :  { %1571 = vmatpush1.bf16.msra.mxu0 %v5551_v47  ;;  %1653 = vmatpush1.bf16.msra.mxu1 %v5554_v48  ;;  %v5605_v47 = vld [vmem:[#allocation6 + $0x3a0] ss:$16 sps:$4 sm:$0xff]   ;;  %v5608_v48 = vld [vmem:[#allocation6 + $0x3a8] ss:$16 sps:$4 sm:$0xff]  }
 0x16e   :  { %1572 = vmatprep.subr.bf16.mxu0 %v5559_v50  ;;  %1654 = vmatprep.subr.bf16.mxu1 %v5562_v51  ;;  %v537_v50 = vadd.f32 %v6424_v19, %v161_v44  ;;  %v5613_v51 = vld [vmem:[#allocation6 + $0x3c4] ss:$16 sps:$4 sm:$0xff]   ;;  %v5668_v44 = vld [vmem:[#allocation6 + $0x4e8] ss:$16 sps:$4 sm:$0xff]  }
 0x16f   :  { %v5625_v19 = vld [vmem:[#allocation6 + $0x404] ss:$16 sps:$4 sm:$0xff]  }
 0x171   :  { %1573 = vmatpush1.bf16.msra.mxu0 %v5557_v54  ;;  %1655 = vmatpush1.bf16.msra.mxu1 %v5560_v55  ;;  %v5611_v54 = vld [vmem:[#allocation6 + $0x3c0] ss:$16 sps:$4 sm:$0xff]   ;;  %v5614_v55 = vld [vmem:[#allocation6 + $0x3c8] ss:$16 sps:$4 sm:$0xff]  }
 0x172   :  { %1574 = vmatprep.subr.bf16.mxu0 %v5565_v56  ;;  %1656 = vmatprep.subr.bf16.mxu1 %v5568_v57  ;;  %v5619_v56 = vld [vmem:[#allocation6 + $0x3e4] ss:$16 sps:$4 sm:$0xff]   ;;  %v709_v57 = vmax.f32 %v537_v50, 0.0  ;;  %v5674_v50 = vld [vmem:[#allocation6 + $0x508] ss:$16 sps:$4 sm:$0xff]  }
 0x173   :  { %v6439_v0 = vpop.f32.mrb[8].mxu0 }
 0x174   :  { %v6441_v5 = vpop.f32.mrb[9].mxu0 }
 0x175   :  { %1575 = vmatpush1.bf16.msra.mxu0 %v5563_v58  ;;  %1657 = vmatpush1.bf16.msra.mxu1 %v5566_v59  ;;  %v663_v9 = vpop.f32.mrb[10].mxu0  ;;  %v700_v15 = vpop.f32.mrb[8].mxu1  ;;  %v5622_v58 = vld [vmem:[#allocation6 + $0x3ec] ss:$16 sps:$4 sm:$0xff]   ;;  %v580_v59 = vadd.f32 %v6428_v39, %v173_v53  ;;  %v5632_v39 = vld [vmem:[#allocation6 + $0x428] ss:$16 sps:$4 sm:$0xff]  }
 0x176   :  { %1576 = vmatprep.subr.bf16.mxu0 %v5571_v60  ;;  %1658 = vmatprep.subr.bf16.mxu1 %v5574_v61  ;;  %v664_v13 = vpop.f32.mrb[11].mxu0  ;;  %v6447_v18 = vadd.f32 %v700_v15, %v193_v10  ;;  %v702_v20 = vpop.f32.mrb[9].mxu1  ;;  %v5617_v60 = vld [vmem:[#allocation6 + $0x3e0] ss:$16 sps:$4 sm:$0xff]   ;;  %v5620_v61 = vld [vmem:[#allocation6 + $0x3e8] ss:$16 sps:$4 sm:$0xff]  }
 0x177   :  { %v6449_v23 = vadd.f32 %v702_v20, %v197_v14  ;;  %v704_v24 = vpop.f32.mrb[10].mxu1  ;;  %v5623_v9 = vld [vmem:[#allocation6 + $0x400] ss:$16 sps:$4 sm:$0xff]   ;;  %v5626_v10 = vld [vmem:[#allocation6 + $0x408] ss:$16 sps:$4 sm:$0xff]  }
 0x178   :  { %v705_v25 = vpop.f32.mrb[11].mxu1  ;;  %v5634_v13 = vld [vmem:[#allocation6 + $0x42c] ss:$16 sps:$4 sm:$0xff]   ;;  %v5629_v14 = vld [vmem:[#allocation6 + $0x420] ss:$16 sps:$4 sm:$0xff]  }
 0x179   :  { %1577 = vmatpush1.bf16.msra.mxu0 %v5569_v6  ;;  %1659 = vmatpush1.bf16.msra.mxu1 %v5572_v8  ;;  %v5628_v6 = vld [vmem:[#allocation6 + $0x40c] ss:$16 sps:$4 sm:$0xff]   ;;  %v712_v8 = vmax.f32 %v580_v59, 0.0  ;;  %v5635_v20 = vld [vmem:[#allocation6 + $0x440] ss:$16 sps:$4 sm:$0xff]  }
 0x17a   :  { %1578 = vmatprep.subr.bf16.mxu0 %v5577_v11  ;;  %1660 = vmatprep.subr.bf16.mxu1 %v5580_v12  ;;  %v721_v11 = vpack.c.bf16 %v709_v57, %v709_v57  ;;  %v5631_v12 = vld [vmem:[#allocation6 + $0x424] ss:$16 sps:$4 sm:$0xff]   ;;  %v5646_v24 = vld [vmem:[#allocation6 + $0x46c] ss:$16 sps:$4 sm:$0xff]   ;;  %v5641_v25 = vld [vmem:[#allocation6 + $0x460] ss:$16 sps:$4 sm:$0xff]  }
 0x17b   :  { %v724_v15 = vpack.c.bf16 %v712_v8, %v712_v8  ;;  %v5677_v53 = vld [vmem:[#allocation6 + $0x520] ss:$16 sps:$4 sm:$0xff]   ;;  %v5691_v59 = vld [vmem:[#allocation6 + $0x564] ss:$16 sps:$4 sm:$0xff]   ;;  %v5700_v8 = vld [vmem:[#allocation6 + $0x58c] ss:$16 sps:$4 sm:$0xff]  }
 0x17c   :  { %v5683_v57 = vld [vmem:[#allocation6 + $0x540] ss:$16 sps:$4 sm:$0xff]  }
 0x17d   :  { %1579 = vmatpush1.bf16.msra.mxu0 %v5575_v16  ;;  %1661 = vmatpush1.bf16.msra.mxu1 %v5578_v17  ;;  %v5637_v16 = vld [vmem:[#allocation6 + $0x444] ss:$16 sps:$4 sm:$0xff]   ;;  %v5640_v17 = vld [vmem:[#allocation6 + $0x44c] ss:$16 sps:$4 sm:$0xff]  }
 0x17e   :  { %1580 = vmatprep.subr.bf16.mxu0 %v5583_v21  ;;  %1662 = vmatprep.subr.bf16.mxu1 %v5586_v22  ;;  %v5638_v21 = vld [vmem:[#allocation6 + $0x448] ss:$16 sps:$4 sm:$0xff]   ;;  %v5643_v22 = vld [vmem:[#allocation6 + $0x464] ss:$16 sps:$4 sm:$0xff]  }
 0x181   :  { %1581 = vmatpush1.bf16.msra.mxu0 %v5581_v26  ;;  %1663 = vmatpush1.bf16.msra.mxu1 %v5584_v27  ;;  %v5644_v26 = vld [vmem:[#allocation6 + $0x468] ss:$16 sps:$4 sm:$0xff]   ;;  %v5649_v27 = vld [vmem:[#allocation6 + $0x484] ss:$16 sps:$4 sm:$0xff]  }
 0x182   :  { %1582 = vmatprep.subr.bf16.mxu0 %v5589_v28  ;;  %1664 = vmatprep.subr.bf16.mxu1 %v5592_v29  ;;  %v5652_v28 = vld [vmem:[#allocation6 + $0x48c] ss:$16 sps:$4 sm:$0xff]   ;;  %v5647_v29 = vld [vmem:[#allocation6 + $0x480] ss:$16 sps:$4 sm:$0xff]  }
 0x185   :  { %1583 = vmatpush1.bf16.msra.mxu0 %v5587_v30  ;;  %1665 = vmatpush1.bf16.msra.mxu1 %v5590_v31  ;;  %v5650_v30 = vld [vmem:[#allocation6 + $0x488] ss:$16 sps:$4 sm:$0xff]   ;;  %v5655_v31 = vld [vmem:[#allocation6 + $0x4a4] ss:$16 sps:$4 sm:$0xff]  }
 0x186   :  { %1584 = vmatprep.subr.bf16.mxu0 %v5595_v32  ;;  %1666 = vmatprep.subr.bf16.mxu1 %v5598_v33  ;;  %v5658_v32 = vld [vmem:[#allocation6 + $0x4ac] ss:$16 sps:$4 sm:$0xff]   ;;  %v5653_v33 = vld [vmem:[#allocation6 + $0x4a0] ss:$16 sps:$4 sm:$0xff]  }
 0x189   :  { %1585 = vmatpush1.bf16.msra.mxu0 %v5593_v34  ;;  %1667 = vmatpush1.bf16.msra.mxu1 %v5596_v35  ;;  %v5656_v34 = vld [vmem:[#allocation6 + $0x4a8] ss:$16 sps:$4 sm:$0xff]   ;;  %v5661_v35 = vld [vmem:[#allocation6 + $0x4c4] ss:$16 sps:$4 sm:$0xff]  }
 0x18a   :  { %1586 = vmatprep.subr.bf16.mxu0 %v5601_v36  ;;  %1668 = vmatprep.subr.bf16.mxu1 %v5604_v37  ;;  %v5664_v36 = vld [vmem:[#allocation6 + $0x4cc] ss:$16 sps:$4 sm:$0xff]   ;;  %v5659_v37 = vld [vmem:[#allocation6 + $0x4c0] ss:$16 sps:$4 sm:$0xff]  }
 0x18d   :  { %1587 = vmatpush1.bf16.msra.mxu0 %v5599_v40  ;;  %1669 = vmatpush1.bf16.msra.mxu1 %v5602_v41  ;;  %v5662_v40 = vld [vmem:[#allocation6 + $0x4c8] ss:$16 sps:$4 sm:$0xff]   ;;  %v5667_v41 = vld [vmem:[#allocation6 + $0x4e4] ss:$16 sps:$4 sm:$0xff]  }
 0x18e   :  { %1588 = vmatprep.subr.bf16.mxu0 %v5607_v42  ;;  %1670 = vmatprep.subr.bf16.mxu1 %v5610_v43  ;;  %v5670_v42 = vld [vmem:[#allocation6 + $0x4ec] ss:$16 sps:$4 sm:$0xff]   ;;  %v5665_v43 = vld [vmem:[#allocation6 + $0x4e0] ss:$16 sps:$4 sm:$0xff]  }
 0x191   :  { %1589 = vmatpush1.bf16.msra.mxu0 %v5605_v47  ;;  %1671 = vmatpush1.bf16.msra.mxu1 %v5608_v48  ;;  %v5676_v47 = vld [vmem:[#allocation6 + $0x50c] ss:$16 sps:$4 sm:$0xff]   ;;  %v5671_v48 = vld [vmem:[#allocation6 + $0x500] ss:$16 sps:$4 sm:$0xff]  }
 0x192   :  { %1590 = vmatprep.subr.bf16.mxu0 %v5613_v51  ;;  %1672 = vmatprep.subr.bf16.mxu1 %v5616_v52  ;;  %v5679_v51 = vld [vmem:[#allocation6 + $0x524] ss:$16 sps:$4 sm:$0xff]   ;;  %v5682_v52 = vld [vmem:[#allocation6 + $0x52c] ss:$16 sps:$4 sm:$0xff]  }
 0x195   :  { %1591 = vmatpush1.bf16.msra.mxu0 %v5611_v54  ;;  %1673 = vmatpush1.bf16.msra.mxu1 %v5614_v55  ;;  %v5680_v54 = vld [vmem:[#allocation6 + $0x528] ss:$16 sps:$4 sm:$0xff]   ;;  %v5685_v55 = vld [vmem:[#allocation6 + $0x544] ss:$16 sps:$4 sm:$0xff]  }
 0x196   :  { %1592 = vmatprep.subr.bf16.mxu0 %v5619_v56  ;;  %1674 = vmatprep.subr.bf16.mxu1 %v5622_v58  ;;  %v5688_v56 = vld [vmem:[#allocation6 + $0x54c] ss:$16 sps:$4 sm:$0xff]   ;;  %v5686_v58 = vld [vmem:[#allocation6 + $0x548] ss:$16 sps:$4 sm:$0xff]  }
 0x199   :  { %1593 = vmatpush1.bf16.msra.mxu0 %v5617_v60  ;;  %1675 = vmatpush1.bf16.msra.mxu1 %v5620_v61  ;;  %v5694_v60 = vld [vmem:[#allocation6 + $0x56c] ss:$16 sps:$4 sm:$0xff]   ;;  %v5689_v61 = vld [vmem:[#allocation6 + $0x560] ss:$16 sps:$4 sm:$0xff]  }
 0x19a   :  { %2484 = vmatprep.subr.bf16.mxu0 %v5625_v19  ;;  %2566 = vmatprep.subr.bf16.mxu1 %v5628_v6  ;;  %v5692_v19 = vld [vmem:[#allocation6 + $0x568] ss:$16 sps:$4 sm:$0xff]   ;;  %v5697_v6 = vld [vmem:[#allocation6 + $0x584] ss:$16 sps:$4 sm:$0xff]  }
 0x19c   :  { %1595 = vmatmul.mubr.bf16.vlgmr.msra.gmra.mrb[12].mxu0 %v721_v11  ;;  %1677 = vmatmul.mubr.bf16.vlgmr.msra.gmra.mrb[12].mxu1 %v721_v11  ;;  %v5698_v11 = vld [vmem:[#allocation6 + $0x588] ss:$16 sps:$4 sm:$0xff]  }
 0x19d   :  { %2485 = vmatpush1.bf16.msra.mxu0 %v5623_v9  ;;  %2567 = vmatpush1.bf16.msra.mxu1 %v5626_v10  ;;  %v168_v9 = vsub.s32 4, %v6405_v1  ;;  %v5695_v10 = vld [vmem:[#allocation6 + $0x580] ss:$16 sps:$4 sm:$0xff]  }
 0x19e   :  { %2486 = vmatprep.subr.bf16.mxu0 %v5631_v12  ;;  %2568 = vmatprep.subr.bf16.mxu1 %v5634_v13  ;;  %v5703_v12 = vld [vmem:[#allocation6 + $0x5a4] ss:$16 sps:$4 sm:$0xff]   ;;  %v5706_v13 = vld [vmem:[#allocation6 + $0x5ac] ss:$16 sps:$4 sm:$0xff]  }
 0x19f   :  { %2516 = vmatprep.mubr.bf16.mxu0 %v724_v15  ;;  %2598 = vmatprep.mubr.bf16.mxu1 %v724_v15  ;;  %v5701_v15 = vld [vmem:[#allocation6 + $0x5a0] ss:$16 sps:$4 sm:$0xff]  }
 0x1a1   :  { %2487 = vmatpush1.bf16.msra.mxu0 %v5629_v14  ;;  %2569 = vmatpush1.bf16.msra.mxu1 %v5632_v39  ;;  %v180_v14 = vsub.s32 7, %v6405_v1  ;;  %v169_v39 = vrot.slane %v6410_v3, %v168_v9  ;;  %v5766_v9 = vld [vmem:[#allocation6 + $0x6ec] ss:$16 sps:$4 sm:$0xff]  }
 0x1a2   :  { %2488 = vmatprep.subr.bf16.mxu0 %v5637_v16  ;;  %2570 = vmatprep.subr.bf16.mxu1 %v5640_v17  ;;  %v5704_v16 = vld [vmem:[#allocation6 + $0x5a8] ss:$16 sps:$4 sm:$0xff]   ;;  %v5709_v17 = vld [vmem:[#allocation6 + $0x5c4] ss:$16 sps:$4 sm:$0xff]  }
 0x1a5   :  { %2489 = vmatpush1.bf16.msra.mxu0 %v5635_v20  ;;  %2571 = vmatpush1.bf16.msra.mxu1 %v5638_v21  ;;  %v5712_v20 = vld [vmem:[#allocation6 + $0x5cc] ss:$16 sps:$4 sm:$0xff]   ;;  %v181_v21 = vrot.slane %v6410_v3, %v180_v14  ;;  %v5721_v3 = vld [vmem:[#allocation6 + $0x604] ss:$16 sps:$4 sm:$0xff]   ;;  %v5767_v14 = vld [vmem:[#allocation6 + $0x700] ss:$16 sps:$4 sm:$0xff]  }
 0x1a6   :  { %2490 = vmatprep.subr.bf16.mxu0 %v5643_v22  ;;  %2572 = vmatprep.subr.bf16.mxu1 %v5646_v24  ;;  %v578_v22 = vadd.f32 %v6426_v38, %v169_v39  ;;  %v5707_v24 = vld [vmem:[#allocation6 + $0x5c0] ss:$16 sps:$4 sm:$0xff]   ;;  %v5770_v39 = vld [vmem:[#allocation6 + $0x708] ss:$16 sps:$4 sm:$0xff]  }
 0x1a9   :  { %2491 = vmatpush1.bf16.msra.mxu0 %v5641_v25  ;;  %2573 = vmatpush1.bf16.msra.mxu1 %v5644_v26  ;;  %v5710_v25 = vld [vmem:[#allocation6 + $0x5c8] ss:$16 sps:$4 sm:$0xff]   ;;  %v5715_v26 = vld [vmem:[#allocation6 + $0x5e4] ss:$16 sps:$4 sm:$0xff]  }
 0x1aa   :  { %2492 = vmatprep.subr.bf16.mxu0 %v5649_v27  ;;  %2574 = vmatprep.subr.bf16.mxu1 %v5652_v28  ;;  %v5718_v27 = vld [vmem:[#allocation6 + $0x5ec] ss:$16 sps:$4 sm:$0xff]   ;;  %v621_v28 = vadd.f32 %v6432_v49, %v181_v21  ;;  %v5781_v21 = vld [vmem:[#allocation6 + $0x744] ss:$16 sps:$4 sm:$0xff]  }
 0x1ac   :  { %v714_v38 = vmax.f32 %v621_v28, 0.0  ;;  %v5785_v28 = vld [vmem:[#allocation6 + $0x760] ss:$16 sps:$4 sm:$0xff]  }
 0x1ad   :  { %2493 = vmatpush1.bf16.msra.mxu0 %v5647_v29  ;;  %2575 = vmatpush1.bf16.msra.mxu1 %v5650_v30  ;;  %v711_v29 = vmax.f32 %v578_v22, 0.0  ;;  %v5713_v30 = vld [vmem:[#allocation6 + $0x5e0] ss:$16 sps:$4 sm:$0xff]   ;;  %v5784_v22 = vld [vmem:[#allocation6 + $0x74c] ss:$16 sps:$4 sm:$0xff]  }
 0x1ae   :  { %2494 = vmatprep.subr.bf16.mxu0 %v5655_v31  ;;  %2576 = vmatprep.subr.bf16.mxu1 %v5658_v32  ;;  %v5716_v31 = vld [vmem:[#allocation6 + $0x5e8] ss:$16 sps:$4 sm:$0xff]   ;;  %v5724_v32 = vld [vmem:[#allocation6 + $0x60c] ss:$16 sps:$4 sm:$0xff]   ;;  %v726_v49 = vpack.c.bf16 %v714_v38, %v714_v38  ;;  %v176_v38 = vsub.s32 6, %v6405_v1 }
 0x1af   :  { %v5803_v1 = vld [vmem:[#allocation6 + $0x7c0] ss:$16 sps:$4 sm:$0xff]  }
 0x1b1   :  { %2495 = vmatpush1.bf16.msra.mxu0 %v5653_v33  ;;  %2577 = vmatpush1.bf16.msra.mxu1 %v5656_v34  ;;  %v723_v33 = vpack.c.bf16 %v711_v29, %v711_v29  ;;  %v5719_v34 = vld [vmem:[#allocation6 + $0x600] ss:$16 sps:$4 sm:$0xff]   ;;  %v5788_v29 = vld [vmem:[#allocation6 + $0x768] ss:$16 sps:$4 sm:$0xff]  }
 0x1b2   :  { %2496 = vmatprep.subr.bf16.mxu0 %v5661_v35  ;;  %2578 = vmatprep.subr.bf16.mxu1 %v5664_v36  ;;  %v5722_v35 = vld [vmem:[#allocation6 + $0x608] ss:$16 sps:$4 sm:$0xff]   ;;  %v5727_v36 = vld [vmem:[#allocation6 + $0x624] ss:$16 sps:$4 sm:$0xff]  }
 0x1b5   :  { %2497 = vmatpush1.bf16.msra.mxu0 %v5659_v37  ;;  %2579 = vmatpush1.bf16.msra.mxu1 %v5662_v40  ;;  %v5730_v37 = vld [vmem:[#allocation6 + $0x62c] ss:$16 sps:$4 sm:$0xff]   ;;  %v5725_v40 = vld [vmem:[#allocation6 + $0x620] ss:$16 sps:$4 sm:$0xff]  }
 0x1b6   :  { %2498 = vmatprep.subr.bf16.mxu0 %v5667_v41  ;;  %2580 = vmatprep.subr.bf16.mxu1 %v5670_v42  ;;  %v5728_v41 = vld [vmem:[#allocation6 + $0x628] ss:$16 sps:$4 sm:$0xff]   ;;  %v5733_v42 = vld [vmem:[#allocation6 + $0x644] ss:$16 sps:$4 sm:$0xff]  }
 0x1b9   :  { %2499 = vmatpush1.bf16.msra.mxu0 %v5665_v43  ;;  %2581 = vmatpush1.bf16.msra.mxu1 %v5668_v44  ;;  %v5736_v43 = vld [vmem:[#allocation6 + $0x64c] ss:$16 sps:$4 sm:$0xff]   ;;  %v5731_v44 = vld [vmem:[#allocation6 + $0x640] ss:$16 sps:$4 sm:$0xff]  }
 0x1ba   :  { %2500 = vmatprep.subr.bf16.mxu0 %v5673_v45  ;;  %2582 = vmatprep.subr.bf16.mxu1 %v5676_v47  ;;  %v5734_v45 = vld [vmem:[#allocation6 + $0x648] ss:$16 sps:$4 sm:$0xff]   ;;  %v5739_v47 = vld [vmem:[#allocation6 + $0x664] ss:$16 sps:$4 sm:$0xff]  }
 0x1bd   :  { %2501 = vmatpush1.bf16.msra.mxu0 %v5671_v48  ;;  %2583 = vmatpush1.bf16.msra.mxu1 %v5674_v50  ;;  %v5742_v48 = vld [vmem:[#allocation6 + $0x66c] ss:$16 sps:$4 sm:$0xff]   ;;  %v5737_v50 = vld [vmem:[#allocation6 + $0x660] ss:$16 sps:$4 sm:$0xff]  }
 0x1be   :  { %2502 = vmatprep.subr.bf16.mxu0 %v5679_v51  ;;  %2584 = vmatprep.subr.bf16.mxu1 %v5682_v52  ;;  %v5740_v51 = vld [vmem:[#allocation6 + $0x668] ss:$16 sps:$4 sm:$0xff]   ;;  %v5745_v52 = vld [vmem:[#allocation6 + $0x684] ss:$16 sps:$4 sm:$0xff]  }
 0x1c1   :  { %2503 = vmatpush1.bf16.msra.mxu0 %v5677_v53  ;;  %2585 = vmatpush1.bf16.msra.mxu1 %v5680_v54  ;;  %v5748_v53 = vld [vmem:[#allocation6 + $0x68c] ss:$16 sps:$4 sm:$0xff]   ;;  %v5743_v54 = vld [vmem:[#allocation6 + $0x680] ss:$16 sps:$4 sm:$0xff]  }
 0x1c2   :  { %2504 = vmatprep.subr.bf16.mxu0 %v5685_v55  ;;  %2586 = vmatprep.subr.bf16.mxu1 %v5688_v56  ;;  %v5746_v55 = vld [vmem:[#allocation6 + $0x688] ss:$16 sps:$4 sm:$0xff]   ;;  %v5751_v56 = vld [vmem:[#allocation6 + $0x6a4] ss:$16 sps:$4 sm:$0xff]  }
 0x1c5   :  { %2505 = vmatpush1.bf16.msra.mxu0 %v5683_v57  ;;  %2587 = vmatpush1.bf16.msra.mxu1 %v5686_v58  ;;  %v5754_v57 = vld [vmem:[#allocation6 + $0x6ac] ss:$16 sps:$4 sm:$0xff]   ;;  %v5749_v58 = vld [vmem:[#allocation6 + $0x6a0] ss:$16 sps:$4 sm:$0xff]  }
 0x1c6   :  { %2506 = vmatprep.subr.bf16.mxu0 %v5691_v59  ;;  %2588 = vmatprep.subr.bf16.mxu1 %v5694_v60  ;;  %v5752_v59 = vld [vmem:[#allocation6 + $0x6a8] ss:$16 sps:$4 sm:$0xff]   ;;  %v5757_v60 = vld [vmem:[#allocation6 + $0x6c4] ss:$16 sps:$4 sm:$0xff]  }
 0x1c9   :  { %2507 = vmatpush1.bf16.msra.mxu0 %v5689_v61  ;;  %2589 = vmatpush1.bf16.msra.mxu1 %v5692_v19  ;;  %v5760_v61 = vld [vmem:[#allocation6 + $0x6cc] ss:$16 sps:$4 sm:$0xff]   ;;  %v5755_v19 = vld [vmem:[#allocation6 + $0x6c0] ss:$16 sps:$4 sm:$0xff]  }
 0x1ca   :  { %2508 = vmatprep.subr.bf16.mxu0 %v5697_v6  ;;  %2590 = vmatprep.subr.bf16.mxu1 %v5700_v8  ;;  %v5758_v6 = vld [vmem:[#allocation6 + $0x6c8] ss:$16 sps:$4 sm:$0xff]   ;;  %v5763_v8 = vld [vmem:[#allocation6 + $0x6e4] ss:$16 sps:$4 sm:$0xff]  }
 0x1cd   :  { %2509 = vmatpush1.bf16.msra.mxu0 %v5695_v10  ;;  %2591 = vmatpush1.bf16.msra.mxu1 %v5698_v11  ;;  %v5761_v10 = vld [vmem:[#allocation6 + $0x6e0] ss:$16 sps:$4 sm:$0xff]   ;;  %v5764_v11 = vld [vmem:[#allocation6 + $0x6e8] ss:$16 sps:$4 sm:$0xff]  }
 0x1ce   :  { %2510 = vmatprep.subr.bf16.mxu0 %v5703_v12  ;;  %2592 = vmatprep.subr.bf16.mxu1 %v5706_v13  ;;  %v5769_v12 = vld [vmem:[#allocation6 + $0x704] ss:$16 sps:$4 sm:$0xff]   ;;  %v5772_v13 = vld [vmem:[#allocation6 + $0x70c] ss:$16 sps:$4 sm:$0xff]  }
 0x1d1   :  { %2511 = vmatpush1.bf16.msra.mxu0 %v5701_v15  ;;  %2593 = vmatpush1.bf16.msra.mxu1 %v5704_v16  ;;  %v5775_v15 = vld [vmem:[#allocation6 + $0x724] ss:$16 sps:$4 sm:$0xff]   ;;  %v5778_v16 = vld [vmem:[#allocation6 + $0x72c] ss:$16 sps:$4 sm:$0xff]  }
 0x1d2   :  { %2512 = vmatprep.subr.bf16.mxu0 %v5709_v17  ;;  %2594 = vmatprep.subr.bf16.mxu1 %v5712_v20  ;;  %v5773_v17 = vld [vmem:[#allocation6 + $0x720] ss:$16 sps:$4 sm:$0xff]   ;;  %v5776_v20 = vld [vmem:[#allocation6 + $0x728] ss:$16 sps:$4 sm:$0xff]  }
 0x1d5   :  { %2513 = vmatpush1.bf16.msra.mxu0 %v5707_v24  ;;  %2595 = vmatpush1.bf16.msra.mxu1 %v5710_v25  ;;  %v5779_v24 = vld [vmem:[#allocation6 + $0x740] ss:$16 sps:$4 sm:$0xff]   ;;  %v5782_v25 = vld [vmem:[#allocation6 + $0x748] ss:$16 sps:$4 sm:$0xff]  }
 0x1d6   :  { %2514 = vmatprep.subr.bf16.mxu0 %v5715_v26  ;;  %2596 = vmatprep.subr.bf16.mxu1 %v5718_v27  ;;  %v5787_v26 = vld [vmem:[#allocation6 + $0x764] ss:$16 sps:$4 sm:$0xff]   ;;  %v5790_v27 = vld [vmem:[#allocation6 + $0x76c] ss:$16 sps:$4 sm:$0xff]  }
 0x1d9   :  { %2515 = vmatpush1.bf16.msra.mxu0 %v5713_v30  ;;  %2597 = vmatpush1.bf16.msra.mxu1 %v5716_v31  ;;  %v5793_v30 = vld [vmem:[#allocation6 + $0x784] ss:$16 sps:$4 sm:$0xff]   ;;  %v5796_v31 = vld [vmem:[#allocation6 + $0x78c] ss:$16 sps:$4 sm:$0xff]  }
 0x1da   :  { %2525 = vmatprep.subr.bf16.mxu0 %v5721_v3  ;;  %2607 = vmatprep.subr.bf16.mxu1 %v5724_v32  ;;  %v5791_v3 = vld [vmem:[#allocation6 + $0x780] ss:$16 sps:$4 sm:$0xff]   ;;  %v5794_v32 = vld [vmem:[#allocation6 + $0x788] ss:$16 sps:$4 sm:$0xff]  }
 0x1dc   :  { %2517 = vmatmul.mubr.bf16.vlgmr.msra.gmra.mrb[16].mxu0 %v723_v33  ;;  %2599 = vmatmul.mubr.bf16.vlgmr.msra.gmra.mrb[16].mxu1 %v723_v33  ;;  %v5799_v33 = vld [vmem:[#allocation6 + $0x7a4] ss:$16 sps:$4 sm:$0xff]  }
 0x1dd   :  { %2526 = vmatpush1.bf16.msra.mxu0 %v5719_v34  ;;  %2608 = vmatpush1.bf16.msra.mxu1 %v5722_v35  ;;  %v5802_v34 = vld [vmem:[#allocation6 + $0x7ac] ss:$16 sps:$4 sm:$0xff]   ;;  %v5797_v35 = vld [vmem:[#allocation6 + $0x7a0] ss:$16 sps:$4 sm:$0xff]  }
 0x1de   :  { %2527 = vmatprep.subr.bf16.mxu0 %v5727_v36  ;;  %2609 = vmatprep.subr.bf16.mxu1 %v5730_v37  ;;  %v5800_v36 = vld [vmem:[#allocation6 + $0x7a8] ss:$16 sps:$4 sm:$0xff]  }
 0x1df   :  { %2557 = vmatprep.mubr.bf16.mxu0 %v726_v49  ;;  %2639 = vmatprep.mubr.bf16.mxu1 %v726_v49  ;;  %v6103_v37 = vld [vmem:[#allocation4] sm:$0xff] }
 0x1e0   :  { %v177_v49 = vrot.slane %v6103_v37, %v176_v38  ;;  %v5866_v38 = vld [vmem:[#allocation6 + $0x908] ss:$16 sps:$4 sm:$0xff]   ;;  %v5877_v37 = vld [vmem:[#allocation6 + $0x944] ss:$16 sps:$4 sm:$0xff]  }
 0x1e1   :  { %2528 = vmatpush1.bf16.msra.mxu0 %v5725_v40  ;;  %2610 = vmatpush1.bf16.msra.mxu1 %v5728_v41  ;;  %v5805_v40 = vld [vmem:[#allocation6 + $0x7c4] ss:$16 sps:$4 sm:$0xff]   ;;  %v5808_v41 = vld [vmem:[#allocation6 + $0x7cc] ss:$16 sps:$4 sm:$0xff]  }
 0x1e2   :  { %2529 = vmatprep.subr.bf16.mxu0 %v5733_v42  ;;  %2611 = vmatprep.subr.bf16.mxu1 %v5736_v43  ;;  %v189_v42 = vrot.slane %v6434_v62, %v6413_v4  ;;  %v5806_v43 = vld [vmem:[#allocation6 + $0x7c8] ss:$16 sps:$4 sm:$0xff]   ;;  %v5817_v62 = vld [vmem:[#allocation6 + $0x804] ss:$16 sps:$4 sm:$0xff]  }
 0x1e5   :  { %2530 = vmatpush1.bf16.msra.mxu0 %v5731_v44  ;;  %2612 = vmatpush1.bf16.msra.mxu1 %v5734_v45  ;;  %v619_v44 = vadd.f32 %v6430_v46, %v177_v49  ;;  %v5811_v45 = vld [vmem:[#allocation6 + $0x7e4] ss:$16 sps:$4 sm:$0xff]   ;;  %v5880_v49 = vld [vmem:[#allocation6 + $0x94c] ss:$16 sps:$4 sm:$0xff]  }
 0x1e6   :  { %2531 = vmatprep.subr.bf16.mxu0 %v5739_v47  ;;  %2613 = vmatprep.subr.bf16.mxu1 %v5742_v48  ;;  %v5814_v47 = vld [vmem:[#allocation6 + $0x7ec] ss:$16 sps:$4 sm:$0xff]   ;;  %v662_v48 = vadd.f32 %v6441_v5, %v189_v42  ;;  %v5883_v42 = vld [vmem:[#allocation6 + $0x964] ss:$16 sps:$4 sm:$0xff]  }
 0x1e7   :  { %v5826_v5 = vld [vmem:[#allocation6 + $0x82c] ss:$16 sps:$4 sm:$0xff]  }
 0x1e9   :  { %2532 = vmatpush1.bf16.msra.mxu0 %v5737_v50  ;;  %2614 = vmatpush1.bf16.msra.mxu1 %v5740_v51  ;;  %v5809_v50 = vld [vmem:[#allocation6 + $0x7e0] ss:$16 sps:$4 sm:$0xff]   ;;  %v5812_v51 = vld [vmem:[#allocation6 + $0x7e8] ss:$16 sps:$4 sm:$0xff]  }
 0x1ea   :  { %2533 = vmatprep.subr.bf16.mxu0 %v5745_v52  ;;  %2615 = vmatprep.subr.bf16.mxu1 %v5748_v53  ;;  %v713_v52 = vmax.f32 %v619_v44, 0.0  ;;  %v5820_v53 = vld [vmem:[#allocation6 + $0x80c] ss:$16 sps:$4 sm:$0xff]   ;;  %v5884_v44 = vld [vmem:[#allocation6 + $0x968] ss:$16 sps:$4 sm:$0xff]  }
 0x1ec   :  { %v725_v46 = vpack.c.bf16 %v713_v52, %v713_v52  ;;  %v5898_v52 = vld [vmem:[#allocation6 + $0x9ac] ss:$16 sps:$4 sm:$0xff]  }
 0x1ed   :  { %2534 = vmatpush1.bf16.msra.mxu0 %v5743_v54  ;;  %2616 = vmatpush1.bf16.msra.mxu1 %v5746_v55  ;;  %v716_v54 = vmax.f32 %v662_v48, 0.0  ;;  %v5815_v55 = vld [vmem:[#allocation6 + $0x800] ss:$16 sps:$4 sm:$0xff]  }
 0x1ee   :  { %2535 = vmatprep.subr.bf16.mxu0 %v5751_v56  ;;  %2617 = vmatprep.subr.bf16.mxu1 %v5754_v57  ;;  %v5818_v56 = vld [vmem:[#allocation6 + $0x808] ss:$16 sps:$4 sm:$0xff]   ;;  %v5887_v48 = vld [vmem:[#allocation6 + $0x980] ss:$16 sps:$4 sm:$0xff]  }
 0x1ef   :  { %v728_v57 = vpack.c.bf16 %v716_v54, %v716_v54 }
 0x1f1   :  { %2536 = vmatpush1.bf16.msra.mxu0 %v5749_v58  ;;  %2618 = vmatpush1.bf16.msra.mxu1 %v5752_v59  ;;  %v5823_v58 = vld [vmem:[#allocation6 + $0x824] ss:$16 sps:$4 sm:$0xff]   ;;  %v5821_v59 = vld [vmem:[#allocation6 + $0x820] ss:$16 sps:$4 sm:$0xff]  }
 0x1f2   :  { %2537 = vmatprep.subr.bf16.mxu0 %v5757_v60  ;;  %2619 = vmatprep.subr.bf16.mxu1 %v5760_v61  ;;  %v5824_v60 = vld [vmem:[#allocation6 + $0x828] ss:$16 sps:$4 sm:$0xff]   ;;  %v5829_v61 = vld [vmem:[#allocation6 + $0x844] ss:$16 sps:$4 sm:$0xff]  }
 0x1f5   :  { %2538 = vmatpush1.bf16.msra.mxu0 %v5755_v19  ;;  %2620 = vmatpush1.bf16.msra.mxu1 %v5758_v6  ;;  %v5832_v19 = vld [vmem:[#allocation6 + $0x84c] ss:$16 sps:$4 sm:$0xff]   ;;  %v5827_v6 = vld [vmem:[#allocation6 + $0x840] ss:$16 sps:$4 sm:$0xff]  }
 0x1f6   :  { %2539 = vmatprep.subr.bf16.mxu0 %v5763_v8  ;;  %2621 = vmatprep.subr.bf16.mxu1 %v5766_v9  ;;  %v5830_v8 = vld [vmem:[#allocation6 + $0x848] ss:$16 sps:$4 sm:$0xff]   ;;  %v5835_v9 = vld [vmem:[#allocation6 + $0x864] ss:$16 sps:$4 sm:$0xff]  }
 0x1f9   :  { %2540 = vmatpush1.bf16.msra.mxu0 %v5761_v10  ;;  %2622 = vmatpush1.bf16.msra.mxu1 %v5764_v11  ;;  %v5838_v10 = vld [vmem:[#allocation6 + $0x86c] ss:$16 sps:$4 sm:$0xff]   ;;  %v5833_v11 = vld [vmem:[#allocation6 + $0x860] ss:$16 sps:$4 sm:$0xff]  }
 0x1fa   :  { %2541 = vmatprep.subr.bf16.mxu0 %v5769_v12  ;;  %2623 = vmatprep.subr.bf16.mxu1 %v5772_v13  ;;  %v5836_v12 = vld [vmem:[#allocation6 + $0x868] ss:$16 sps:$4 sm:$0xff]   ;;  %v5841_v13 = vld [vmem:[#allocation6 + $0x884] ss:$16 sps:$4 sm:$0xff]  }
 0x1fd   :  { %2542 = vmatpush1.bf16.msra.mxu0 %v5767_v14  ;;  %2624 = vmatpush1.bf16.msra.mxu1 %v5770_v39  ;;  %v5844_v14 = vld [vmem:[#allocation6 + $0x88c] ss:$16 sps:$4 sm:$0xff]   ;;  %v5839_v39 = vld [vmem:[#allocation6 + $0x880] ss:$16 sps:$4 sm:$0xff]  }
 0x1fe   :  { %2543 = vmatprep.subr.bf16.mxu0 %v5775_v15  ;;  %2625 = vmatprep.subr.bf16.mxu1 %v5778_v16  ;;  %v5842_v15 = vld [vmem:[#allocation6 + $0x888] ss:$16 sps:$4 sm:$0xff]   ;;  %v5847_v16 = vld [vmem:[#allocation6 + $0x8a4] ss:$16 sps:$4 sm:$0xff]  }
 0x201   :  { %2544 = vmatpush1.bf16.msra.mxu0 %v5773_v17  ;;  %2626 = vmatpush1.bf16.msra.mxu1 %v5776_v20  ;;  %v5850_v17 = vld [vmem:[#allocation6 + $0x8ac] ss:$16 sps:$4 sm:$0xff]   ;;  %v5845_v20 = vld [vmem:[#allocation6 + $0x8a0] ss:$16 sps:$4 sm:$0xff]  }
 0x202   :  { %2545 = vmatprep.subr.bf16.mxu0 %v5781_v21  ;;  %2627 = vmatprep.subr.bf16.mxu1 %v5784_v22  ;;  %v5848_v21 = vld [vmem:[#allocation6 + $0x8a8] ss:$16 sps:$4 sm:$0xff]   ;;  %v5853_v22 = vld [vmem:[#allocation6 + $0x8c4] ss:$16 sps:$4 sm:$0xff]  }
 0x205   :  { %2546 = vmatpush1.bf16.msra.mxu0 %v5779_v24  ;;  %2628 = vmatpush1.bf16.msra.mxu1 %v5782_v25  ;;  %v5856_v24 = vld [vmem:[#allocation6 + $0x8cc] ss:$16 sps:$4 sm:$0xff]   ;;  %v5851_v25 = vld [vmem:[#allocation6 + $0x8c0] ss:$16 sps:$4 sm:$0xff]  }
 0x206   :  { %2547 = vmatprep.subr.bf16.mxu0 %v5787_v26  ;;  %2629 = vmatprep.subr.bf16.mxu1 %v5790_v27  ;;  %v5854_v26 = vld [vmem:[#allocation6 + $0x8c8] ss:$16 sps:$4 sm:$0xff]   ;;  %v5859_v27 = vld [vmem:[#allocation6 + $0x8e4] ss:$16 sps:$4 sm:$0xff]  }
 0x209   :  { %2548 = vmatpush1.bf16.msra.mxu0 %v5785_v28  ;;  %2630 = vmatpush1.bf16.msra.mxu1 %v5788_v29  ;;  %v5862_v28 = vld [vmem:[#allocation6 + $0x8ec] ss:$16 sps:$4 sm:$0xff]   ;;  %v5857_v29 = vld [vmem:[#allocation6 + $0x8e0] ss:$16 sps:$4 sm:$0xff]  }
 0x20a   :  { %2549 = vmatprep.subr.bf16.mxu0 %v5793_v30  ;;  %2631 = vmatprep.subr.bf16.mxu1 %v5796_v31  ;;  %v5860_v30 = vld [vmem:[#allocation6 + $0x8e8] ss:$16 sps:$4 sm:$0xff]   ;;  %v5865_v31 = vld [vmem:[#allocation6 + $0x904] ss:$16 sps:$4 sm:$0xff]  }
 0x20d   :  { %2550 = vmatpush1.bf16.msra.mxu0 %v5791_v3  ;;  %2632 = vmatpush1.bf16.msra.mxu1 %v5794_v32  ;;  %v5868_v3 = vld [vmem:[#allocation6 + $0x90c] ss:$16 sps:$4 sm:$0xff]   ;;  %v5863_v32 = vld [vmem:[#allocation6 + $0x900] ss:$16 sps:$4 sm:$0xff]  }
 0x20e   :  { %2551 = vmatprep.subr.bf16.mxu0 %v5799_v33  ;;  %2633 = vmatprep.subr.bf16.mxu1 %v5802_v34  ;;  %v5871_v33 = vld [vmem:[#allocation6 + $0x924] ss:$16 sps:$4 sm:$0xff]   ;;  %v5874_v34 = vld [vmem:[#allocation6 + $0x92c] ss:$16 sps:$4 sm:$0xff]  }
 0x211   :  { %2552 = vmatpush1.bf16.msra.mxu0 %v5797_v35  ;;  %2634 = vmatpush1.bf16.msra.mxu1 %v5800_v36  ;;  %v5869_v35 = vld [vmem:[#allocation6 + $0x920] ss:$16 sps:$4 sm:$0xff]   ;;  %v5872_v36 = vld [vmem:[#allocation6 + $0x928] ss:$16 sps:$4 sm:$0xff]  }
 0x212   :  { %2553 = vmatprep.subr.bf16.mxu0 %v5805_v40  ;;  %2635 = vmatprep.subr.bf16.mxu1 %v5808_v41  ;;  %v5875_v40 = vld [vmem:[#allocation6 + $0x940] ss:$16 sps:$4 sm:$0xff]   ;;  %v5878_v41 = vld [vmem:[#allocation6 + $0x948] ss:$16 sps:$4 sm:$0xff]  }
 0x215   :  { %2554 = vmatpush1.bf16.msra.mxu0 %v5803_v1  ;;  %2636 = vmatpush1.bf16.msra.mxu1 %v5806_v43  ;;  %v5886_v1 = vld [vmem:[#allocation6 + $0x96c] ss:$16 sps:$4 sm:$0xff]   ;;  %v5881_v43 = vld [vmem:[#allocation6 + $0x960] ss:$16 sps:$4 sm:$0xff]  }
 0x216   :  { %2555 = vmatprep.subr.bf16.mxu0 %v5811_v45  ;;  %2637 = vmatprep.subr.bf16.mxu1 %v5814_v47  ;;  %v5889_v45 = vld [vmem:[#allocation6 + $0x984] ss:$16 sps:$4 sm:$0xff]   ;;  %v5892_v47 = vld [vmem:[#allocation6 + $0x98c] ss:$16 sps:$4 sm:$0xff]  }
 0x219   :  { %2556 = vmatpush1.bf16.msra.mxu0 %v5809_v50  ;;  %2638 = vmatpush1.bf16.msra.mxu1 %v5812_v51  ;;  %v5890_v50 = vld [vmem:[#allocation6 + $0x988] ss:$16 sps:$4 sm:$0xff]   ;;  %v5895_v51 = vld [vmem:[#allocation6 + $0x9a4] ss:$16 sps:$4 sm:$0xff]  }
 0x21a   :  { %3447 = vmatprep.subr.bf16.mxu0 %v5817_v62  ;;  %3529 = vmatprep.subr.bf16.mxu1 %v5820_v53  ;;  %v5893_v62 = vld [vmem:[#allocation6 + $0x9a0] ss:$16 sps:$4 sm:$0xff]   ;;  %v6104_v53 = vld [vmem:[#allocation4 + $0x8] sm:$0xf] }
 0x21b   :  { %v185_v54 = vrot.slane %v6104_v53, %v6408_v2  ;;  %v5962_v53 = vld [vmem:[#allocation6 + $0xb08] ss:$16 sps:$4 sm:$0xff]  }
 0x21c   :  { %2558 = vmatmul.mubr.bf16.vlgmr.msra.gmra.mrb[16].mxu0 %v725_v46  ;;  %2640 = vmatmul.mubr.bf16.vlgmr.msra.gmra.mrb[16].mxu1 %v725_v46  ;;  %v5901_v46 = vld [vmem:[#allocation6 + $0x9c4] ss:$16 sps:$4 sm:$0xff]  }
 0x21d   :  { %3448 = vmatpush1.bf16.msra.mxu0 %v5815_v55  ;;  %3479 = vmatprep.mubr.bf16.mxu0 %v728_v57  ;;  %v5896_v55 = vld [vmem:[#allocation6 + $0x9a8] ss:$16 sps:$4 sm:$0xff]  }
 0x21e   :  { %3530 = vmatpush1.bf16.msra.mxu1 %v5818_v56  ;;  %3561 = vmatprep.mubr.bf16.mxu1 %v728_v57  ;;  %v5904_v56 = vld [vmem:[#allocation6 + $0x9cc] ss:$16 sps:$4 sm:$0xff]   ;;  %v5899_v57 = vld [vmem:[#allocation6 + $0x9c0] ss:$16 sps:$4 sm:$0xff]  }
 0x21f   :  { %3449 = vmatprep.subr.bf16.mxu0 %v5823_v58  ;;  %3531 = vmatprep.subr.bf16.mxu1 %v5826_v5  ;;  %v660_v58 = vadd.f32 %v6439_v0, %v185_v54  ;;  %v5902_v5 = vld [vmem:[#allocation6 + $0x9c8] ss:$16 sps:$4 sm:$0xff]   ;;  %v5967_v54 = vld [vmem:[#allocation6 + $0xb24] ss:$16 sps:$4 sm:$0xff]  }
 0x221   :  { %3450 = vmatpush1.bf16.msra.mxu0 %v5821_v59  ;;  %v5907_v59 = vld [vmem:[#allocation6 + $0x9e4] ss:$16 sps:$4 sm:$0xff]  }
 0x222   :  { %3532 = vmatpush1.bf16.msra.mxu1 %v5824_v60  ;;  %3451 = vmatprep.subr.bf16.mxu0 %v5829_v61  ;;  %v5910_v60 = vld [vmem:[#allocation6 + $0x9ec] ss:$16 sps:$4 sm:$0xff]   ;;  %v5905_v61 = vld [vmem:[#allocation6 + $0x9e0] ss:$16 sps:$4 sm:$0xff]  }
 0x223   :  { %3533 = vmatprep.subr.bf16.mxu1 %v5832_v19  ;;  %v715_v19 = vmax.f32 %v660_v58, 0.0  ;;  %v5976_v58 = vld [vmem:[#allocation6 + $0xb4c] ss:$16 sps:$4 sm:$0xff]  }
 0x225   :  { %3452 = vmatpush1.bf16.msra.mxu0 %v5827_v6  ;;  %v5908_v6 = vld [vmem:[#allocation6 + $0x9e8] ss:$16 sps:$4 sm:$0xff]   ;;  %v727_v0 = vpack.c.bf16 %v715_v19, %v715_v19  ;;  %v5977_v19 = vld [vmem:[#allocation6 + $0xb60] ss:$16 sps:$4 sm:$0xff]  }
 0x226   :  { %3534 = vmatpush1.bf16.msra.mxu1 %v5830_v8  ;;  %3453 = vmatprep.subr.bf16.mxu0 %v5835_v9  ;;  %v5913_v8 = vld [vmem:[#allocation6 + $0xa04] ss:$16 sps:$4 sm:$0xff]   ;;  %v5916_v9 = vld [vmem:[#allocation6 + $0xa0c] ss:$16 sps:$4 sm:$0xff]  }
 0x227   :  { %3535 = vmatprep.subr.bf16.mxu1 %v5838_v10  ;;  %v718_v10 = vmax.f32 %v6449_v23, 0.0  ;;  %v5928_v23 = vld [vmem:[#allocation6 + $0xa4c] ss:$16 sps:$4 sm:$0xff]  }
 0x229   :  { %3454 = vmatpush1.bf16.msra.mxu0 %v5833_v11  ;;  %v5911_v11 = vld [vmem:[#allocation6 + $0xa00] ss:$16 sps:$4 sm:$0xff]  }
 0x22a   :  { %3536 = vmatpush1.bf16.msra.mxu1 %v5836_v12  ;;  %3455 = vmatprep.subr.bf16.mxu0 %v5841_v13  ;;  %v5914_v12 = vld [vmem:[#allocation6 + $0xa08] ss:$16 sps:$4 sm:$0xff]   ;;  %v5919_v13 = vld [vmem:[#allocation6 + $0xa24] ss:$16 sps:$4 sm:$0xff]  }
 0x22b   :  { %3537 = vmatprep.subr.bf16.mxu1 %v5844_v14  ;;  %v730_v14 = vpack.c.bf16 %v718_v10, %v718_v10  ;;  %v5983_v10 = vld [vmem:[#allocation6 + $0xb80] ss:$16 sps:$4 sm:$0xff]  }
 0x22d   :  { %3456 = vmatpush1.bf16.msra.mxu0 %v5839_v39  ;;  %v5922_v39 = vld [vmem:[#allocation6 + $0xa2c] ss:$16 sps:$4 sm:$0xff]  }
 0x22e   :  { %3538 = vmatpush1.bf16.msra.mxu1 %v5842_v15  ;;  %3457 = vmatprep.subr.bf16.mxu0 %v5847_v16  ;;  %v5917_v15 = vld [vmem:[#allocation6 + $0xa20] ss:$16 sps:$4 sm:$0xff]   ;;  %v5920_v16 = vld [vmem:[#allocation6 + $0xa28] ss:$16 sps:$4 sm:$0xff]  }
 0x22f   :  { %3539 = vmatprep.subr.bf16.mxu1 %v5850_v17  ;;  %v5925_v17 = vld [vmem:[#allocation6 + $0xa44] ss:$16 sps:$4 sm:$0xff]  }
 0x231   :  { %3458 = vmatpush1.bf16.msra.mxu0 %v5845_v20  ;;  %v5923_v20 = vld [vmem:[#allocation6 + $0xa40] ss:$16 sps:$4 sm:$0xff]  }
 0x232   :  { %3540 = vmatpush1.bf16.msra.mxu1 %v5848_v21  ;;  %3459 = vmatprep.subr.bf16.mxu0 %v5853_v22  ;;  %v5926_v21 = vld [vmem:[#allocation6 + $0xa48] ss:$16 sps:$4 sm:$0xff]   ;;  %v5931_v22 = vld [vmem:[#allocation6 + $0xa64] ss:$16 sps:$4 sm:$0xff]  }
 0x233   :  { %3541 = vmatprep.subr.bf16.mxu1 %v5856_v24  ;;  %v5934_v24 = vld [vmem:[#allocation6 + $0xa6c] ss:$16 sps:$4 sm:$0xff]  }
 0x235   :  { %3460 = vmatpush1.bf16.msra.mxu0 %v5851_v25  ;;  %v5929_v25 = vld [vmem:[#allocation6 + $0xa60] ss:$16 sps:$4 sm:$0xff]  }
 0x236   :  { %3542 = vmatpush1.bf16.msra.mxu1 %v5854_v26  ;;  %3461 = vmatprep.subr.bf16.mxu0 %v5859_v27  ;;  %v5932_v26 = vld [vmem:[#allocation6 + $0xa68] ss:$16 sps:$4 sm:$0xff]   ;;  %v5937_v27 = vld [vmem:[#allocation6 + $0xa84] ss:$16 sps:$4 sm:$0xff]  }
 0x237   :  { %3543 = vmatprep.subr.bf16.mxu1 %v5862_v28  ;;  %v5940_v28 = vld [vmem:[#allocation6 + $0xa8c] ss:$16 sps:$4 sm:$0xff]  }
 0x239   :  { %3462 = vmatpush1.bf16.msra.mxu0 %v5857_v29  ;;  %v5935_v29 = vld [vmem:[#allocation6 + $0xa80] ss:$16 sps:$4 sm:$0xff]  }
 0x23a   :  { %3544 = vmatpush1.bf16.msra.mxu1 %v5860_v30  ;;  %3463 = vmatprep.subr.bf16.mxu0 %v5865_v31  ;;  %v5938_v30 = vld [vmem:[#allocation6 + $0xa88] ss:$16 sps:$4 sm:$0xff]   ;;  %v5943_v31 = vld [vmem:[#allocation6 + $0xaa4] ss:$16 sps:$4 sm:$0xff]  }
 0x23b   :  { %3545 = vmatprep.subr.bf16.mxu1 %v5868_v3  ;;  %v5946_v3 = vld [vmem:[#allocation6 + $0xaac] ss:$16 sps:$4 sm:$0xff]  }
 0x23d   :  { %3464 = vmatpush1.bf16.msra.mxu0 %v5863_v32  ;;  %v5941_v32 = vld [vmem:[#allocation6 + $0xaa0] ss:$16 sps:$4 sm:$0xff]  }
 0x23e   :  { %3546 = vmatpush1.bf16.msra.mxu1 %v5866_v38  ;;  %3465 = vmatprep.subr.bf16.mxu0 %v5871_v33  ;;  %v5944_v38 = vld [vmem:[#allocation6 + $0xaa8] ss:$16 sps:$4 sm:$0xff]   ;;  %v5949_v33 = vld [vmem:[#allocation6 + $0xac4] ss:$16 sps:$4 sm:$0xff]  }
 0x23f   :  { %3547 = vmatprep.subr.bf16.mxu1 %v5874_v34 }
 0x241   :  { %3466 = vmatpush1.bf16.msra.mxu0 %v5869_v35 }
 0x242   :  { %3548 = vmatpush1.bf16.msra.mxu1 %v5872_v36  ;;  %3467 = vmatprep.subr.bf16.mxu0 %v5877_v37  ;;  %v5952_v36 = vld [vmem:[#allocation6 + $0xacc] ss:$16 sps:$4 sm:$0xff]  }
 0x243   :  { %3549 = vmatprep.subr.bf16.mxu1 %v5880_v49 }
 0x245   :  { %3468 = vmatpush1.bf16.msra.mxu0 %v5875_v40 }
 0x246   :  { %3550 = vmatpush1.bf16.msra.mxu1 %v5878_v41  ;;  %3469 = vmatprep.subr.bf16.mxu0 %v5883_v42  ;;  %v5947_v42 = vld [vmem:[#allocation6 + $0xac0] ss:$16 sps:$4 sm:$0xff]  }
 0x247   :  { %3551 = vmatprep.subr.bf16.mxu1 %v5886_v1 }
 0x249   :  { %3470 = vmatpush1.bf16.msra.mxu0 %v5881_v43 }
 0x24a   :  { %3552 = vmatpush1.bf16.msra.mxu1 %v5884_v44  ;;  %3471 = vmatprep.subr.bf16.mxu0 %v5889_v45  ;;  %v5950_v44 = vld [vmem:[#allocation6 + $0xac8] ss:$16 sps:$4 sm:$0xff]   ;;  %v5955_v45 = vld [vmem:[#allocation6 + $0xae4] ss:$16 sps:$4 sm:$0xff]  }
 0x24b   :  { %3553 = vmatprep.subr.bf16.mxu1 %v5892_v47  ;;  %v5958_v47 = vld [vmem:[#allocation6 + $0xaec] ss:$16 sps:$4 sm:$0xff]  }
 0x24d   :  { %3472 = vmatpush1.bf16.msra.mxu0 %v5887_v48  ;;  %v5953_v48 = vld [vmem:[#allocation6 + $0xae0] ss:$16 sps:$4 sm:$0xff]  }
 0x24e   :  { %3554 = vmatpush1.bf16.msra.mxu1 %v5890_v50  ;;  %3473 = vmatprep.subr.bf16.mxu0 %v5895_v51  ;;  %v5956_v50 = vld [vmem:[#allocation6 + $0xae8] ss:$16 sps:$4 sm:$0xff]   ;;  %v5961_v51 = vld [vmem:[#allocation6 + $0xb04] ss:$16 sps:$4 sm:$0xff]  }
 0x24f   :  { %3555 = vmatprep.subr.bf16.mxu1 %v5898_v52  ;;  %v5964_v52 = vld [vmem:[#allocation6 + $0xb0c] ss:$16 sps:$4 sm:$0xff]  }
 0x251   :  { %3474 = vmatpush1.bf16.msra.mxu0 %v5893_v62  ;;  %v5959_v62 = vld [vmem:[#allocation6 + $0xb00] ss:$16 sps:$4 sm:$0xff]  }
 0x252   :  { %3556 = vmatpush1.bf16.msra.mxu1 %v5896_v55  ;;  %3475 = vmatprep.subr.bf16.mxu0 %v5901_v46  ;;  %v5970_v55 = vld [vmem:[#allocation6 + $0xb2c] ss:$16 sps:$4 sm:$0xff]   ;;  %v5965_v46 = vld [vmem:[#allocation6 + $0xb20] ss:$16 sps:$4 sm:$0xff]  }
 0x253   :  { %3557 = vmatprep.subr.bf16.mxu1 %v5904_v56  ;;  %v5968_v56 = vld [vmem:[#allocation6 + $0xb28] ss:$16 sps:$4 sm:$0xff]  }
 0x255   :  { %3476 = vmatpush1.bf16.msra.mxu0 %v5899_v57  ;;  %v5973_v57 = vld [vmem:[#allocation6 + $0xb44] ss:$16 sps:$4 sm:$0xff]  }
 0x256   :  { %3558 = vmatpush1.bf16.msra.mxu1 %v5902_v5  ;;  %3477 = vmatprep.subr.bf16.mxu0 %v5907_v59  ;;  %v5971_v5 = vld [vmem:[#allocation6 + $0xb40] ss:$16 sps:$4 sm:$0xff]   ;;  %v5974_v59 = vld [vmem:[#allocation6 + $0xb48] ss:$16 sps:$4 sm:$0xff]  }
 0x257   :  { %3559 = vmatprep.subr.bf16.mxu1 %v5910_v60  ;;  %v5979_v60 = vld [vmem:[#allocation6 + $0xb64] ss:$16 sps:$4 sm:$0xff]  }
 0x259   :  { %3478 = vmatpush1.bf16.msra.mxu0 %v5905_v61  ;;  %v5982_v61 = vld [vmem:[#allocation6 + $0xb6c] ss:$16 sps:$4 sm:$0xff]  }
 0x25a   :  { %3560 = vmatpush1.bf16.msra.mxu1 %v5908_v6  ;;  %3488 = vmatprep.subr.bf16.mxu0 %v5913_v8  ;;  %v5980_v6 = vld [vmem:[#allocation6 + $0xb68] ss:$16 sps:$4 sm:$0xff]   ;;  %v5985_v8 = vld [vmem:[#allocation6 + $0xb84] ss:$16 sps:$4 sm:$0xff]  }
 0x25b   :  { %3570 = vmatprep.subr.bf16.mxu1 %v5916_v9  ;;  %v5988_v9 = vld [vmem:[#allocation6 + $0xb8c] ss:$16 sps:$4 sm:$0xff]  }
 0x25c   :  { %3480 = vmatmul.mubr.bf16.vlgmr.msra.gmra.mrb[20].mxu0 %v727_v0 }
 0x25d   :  { %3562 = vmatmul.mubr.bf16.vlgmr.msra.gmra.mrb[20].mxu1 %v727_v0  ;;  %3489 = vmatpush1.bf16.msra.mxu0 %v5911_v11  ;;  %v5986_v11 = vld [vmem:[#allocation6 + $0xb88] ss:$16 sps:$4 sm:$0xff]   ;;  %v5991_v0 = vld [vmem:[#allocation6 + $0xba4] ss:$16 sps:$4 sm:$0xff]  }
 0x25e   :  { %3520 = vmatprep.mubr.bf16.mxu0 %v730_v14  ;;  %3571 = vmatpush1.bf16.msra.mxu1 %v5914_v12  ;;  %v5994_v12 = vld [vmem:[#allocation6 + $0xbac] ss:$16 sps:$4 sm:$0xff]  }
 0x25f   :  { %3602 = vmatprep.mubr.bf16.mxu1 %v730_v14  ;;  %3490 = vmatprep.subr.bf16.mxu0 %v5919_v13  ;;  %v6479_v13 = vld [vmem:[#allocation7] sm:$0xf] }
 0x260   :  { %3572 = vmatprep.subr.bf16.mxu1 %v5922_v39  ;;  %v5989_v14 = vld [vmem:[#allocation6 + $0xba0] ss:$16 sps:$4 sm:$0xff]   ;;  %v5992_v39 = vld [vmem:[#allocation6 + $0xba8] ss:$16 sps:$4 sm:$0xff]  }
 0x261   :  { %3491 = vmatpush1.bf16.msra.mxu0 %v5917_v15  ;;  %v5997_v15 = vld [vmem:[#allocation6 + $0xbc4] ss:$16 sps:$4 sm:$0xff]  }
 0x262   :  { %3573 = vmatpush1.bf16.msra.mxu1 %v5920_v16  ;;  %3492 = vmatprep.subr.bf16.mxu0 %v5925_v17  ;;  %v6000_v16 = vld [vmem:[#allocation6 + $0xbcc] ss:$16 sps:$4 sm:$0xff]   ;;  %v868_v17 = vrot.slane %v6479_v13, %v6413_v4 }
 0x263   :  { %3574 = vmatprep.subr.bf16.mxu1 %v5928_v23  ;;  %v876_v23 = vrot.slane %v6479_v13, %v6420_v7 }
 0x265   :  { %3493 = vmatpush1.bf16.msra.mxu0 %v5923_v20  ;;  %v5995_v20 = vld [vmem:[#allocation6 + $0xbc0] ss:$16 sps:$4 sm:$0xff]  }
 0x266   :  { %3575 = vmatpush1.bf16.msra.mxu1 %v5926_v21  ;;  %3494 = vmatprep.subr.bf16.mxu0 %v5931_v22  ;;  %v5998_v21 = vld [vmem:[#allocation6 + $0xbc8] ss:$16 sps:$4 sm:$0xff]   ;;  %v6003_v22 = vld [vmem:[#allocation6 + $0xbe4] ss:$16 sps:$4 sm:$0xff]  }
 0x267   :  { %3576 = vmatprep.subr.bf16.mxu1 %v5934_v24  ;;  %v6006_v24 = vld [vmem:[#allocation6 + $0xbec] ss:$16 sps:$4 sm:$0xff]  }
 0x269   :  { %3495 = vmatpush1.bf16.msra.mxu0 %v5929_v25 }
 0x26a   :  { %3577 = vmatpush1.bf16.msra.mxu1 %v5932_v26  ;;  %3496 = vmatprep.subr.bf16.mxu0 %v5937_v27  ;;  %v6001_v27 = vld [vmem:[#allocation6 + $0xbe0] ss:$16 sps:$4 sm:$0xff]  }
 0x26b   :  { %3578 = vmatprep.subr.bf16.mxu1 %v5940_v28  ;;  %v717_v28 = vmax.f32 %v6447_v18, 0.0 }
 0x26d   :  { %3497 = vmatpush1.bf16.msra.mxu0 %v5935_v29  ;;  %v6004_v29 = vld [vmem:[#allocation6 + $0xbe8] ss:$16 sps:$4 sm:$0xff]  }
 0x26e   :  { %3579 = vmatpush1.bf16.msra.mxu1 %v5938_v30  ;;  %3498 = vmatprep.subr.bf16.mxu0 %v5943_v31  ;;  %v6007_v30 = vld [vmem:[#allocation9 + $0x40] sm:$0xff]  }
 0x26f   :  { %v6471_v34 = vpop.f32.mrb[12].mxu0  ;;  %v6473_v35 = vpop.f32.mrb[12].mxu1  ;;  %3580 = vmatprep.subr.bf16.mxu1 %v5946_v3  ;;  %v6008_v31 = vld [vmem:[#allocation9 + $0xc0] sm:$0xff]  }
 0x270   :  { %v6475_v37 = vpop.f32.mrb[13].mxu0  ;;  %v6477_v49 = vpop.f32.mrb[13].mxu1 }
 0x271   :  { %v1600_v40 = vpop.f32.mrb[14].mxu0  ;;  %v1682_v41 = vpop.f32.mrb[14].mxu1  ;;  %3499 = vmatpush1.bf16.msra.mxu0 %v5941_v32  ;;  %v5317_v25 = vadd.f32 %v6475_v37, %v868_v17  ;;  %v5319_v26 = vadd.f32 %v6477_v49, %v876_v23  ;;  %v6011_v37 = vld [vmem:[#allocation9 + $0x48] sm:$0xff]  }
 0x272   :  { %3581 = vmatpush1.bf16.msra.mxu1 %v5944_v38  ;;  %v1601_v1 = vpop.f32.mrb[15].mxu0  ;;  %v1683_v43 = vpop.f32.mrb[15].mxu1  ;;  %3500 = vmatprep.subr.bf16.mxu0 %v5949_v33  ;;  %v6009_v38 = vld [vmem:[#allocation9] sm:$0xff]   ;;  %v729_v33 = vpack.c.bf16 %v717_v28, %v717_v28  ;;  %v6012_v40 = vld [vmem:[#allocation9 + $0xc8] sm:$0xff]   ;;  %v6052_v28 = vld [vmem:[#allocation9 + $0x1d8] sm:$0xff]  }
 0x273   :  { %3582 = vmatprep.subr.bf16.mxu1 %v5952_v36  ;;  %v1686_v3 = vmax.f32 %v5317_v25, 0.0  ;;  %v1688_v32 = vmax.f32 %v5319_v26, 0.0  ;;  %v6010_v36 = vld [vmem:[#allocation9 + $0x80] sm:$0xff]   ;;  %v6013_v41 = vld [vmem:[#allocation9 + $0x8] sm:$0xff]   ;;  %v6015_v1 = vld [vmem:[#allocation9 + $0x50] sm:$0xff]  }
 0x274   :  { %v6016_v43 = vld [vmem:[#allocation9 + $0xd0] sm:$0xff]   ;;  %v6043_v17 = vld [vmem:[#allocation9 + $0x148] sm:$0xff]  }
 0x275   :  { %3501 = vmatpush1.bf16.msra.mxu0 %v5947_v42  ;;  %v1690_v49 = vpack.c.bf16 %v1686_v3, %v1686_v3  ;;  %v1692_v18 = vpack.c.bf16 %v1688_v32, %v1688_v32  ;;  %v6014_v42 = vld [vmem:[#allocation9 + $0x88] sm:$0xff]   ;;  %v6049_v25 = vld [vmem:[#allocation9 + $0x110] sm:$0xff]   ;;  %v6056_v3 = vld [vmem:[#allocation9 + $0x1e0] sm:$0xff]  }
 0x276   :  { %3583 = vmatpush1.bf16.msra.mxu1 %v5950_v44  ;;  %3502 = vmatprep.subr.bf16.mxu0 %v5955_v45  ;;  %v6017_v44 = vld [vmem:[#allocation9 + $0x10] sm:$0xff]   ;;  %v6044_v23 = vld [vmem:[#allocation9 + $0x1c8] sm:$0xff]   ;;  %v6057_v32 = vld [vmem:[#allocation9 + $0x120] sm:$0xff]  }
 0x277   :  { %3584 = vmatprep.subr.bf16.mxu1 %v5958_v47  ;;  %v6018_v45 = vld [vmem:[#allocation9 + $0x90] sm:$0xff]   ;;  %v6019_v47 = vld [vmem:[#allocation9 + $0x58] sm:$0xff]  }
 0x278   :  { %v6050_v26 = vld [vmem:[#allocation9 + $0x190] sm:$0xff]  }
 0x279   :  { %3503 = vmatpush1.bf16.msra.mxu0 %v5953_v48  ;;  %v6020_v48 = vld [vmem:[#allocation9 + $0xd8] sm:$0xff]  }
 0x27a   :  { %3585 = vmatpush1.bf16.msra.mxu1 %v5956_v50  ;;  %3504 = vmatprep.subr.bf16.mxu0 %v5961_v51  ;;  %v6021_v50 = vld [vmem:[#allocation9 + $0x18] sm:$0xff]  }
 0x27b   :  { %3586 = vmatprep.subr.bf16.mxu1 %v5964_v52  ;;  %v6022_v51 = vld [vmem:[#allocation9 + $0x98] sm:$0xff]   ;;  %v6023_v52 = vld [vmem:[#allocation9 + $0x60] sm:$0xff]  }
 0x27d   :  { %3505 = vmatpush1.bf16.msra.mxu0 %v5959_v62  ;;  %v6024_v62 = vld [vmem:[#allocation9 + $0xe0] sm:$0xff]  }
 0x27e   :  { %3587 = vmatpush1.bf16.msra.mxu1 %v5962_v53  ;;  %3506 = vmatprep.subr.bf16.mxu0 %v5967_v54  ;;  %v6025_v53 = vld [vmem:[#allocation9 + $0x20] sm:$0xff]  }
 0x27f   :  { %3588 = vmatprep.subr.bf16.mxu1 %v5970_v55  ;;  %v6026_v54 = vld [vmem:[#allocation9 + $0xa0] sm:$0xff]   ;;  %v6027_v55 = vld [vmem:[#allocation9 + $0x68] sm:$0xff]  }
 0x281   :  { %3507 = vmatpush1.bf16.msra.mxu0 %v5965_v46  ;;  %v6028_v46 = vld [vmem:[#allocation9 + $0xe8] sm:$0xff]  }
 0x282   :  { %3589 = vmatpush1.bf16.msra.mxu1 %v5968_v56  ;;  %3508 = vmatprep.subr.bf16.mxu0 %v5973_v57  ;;  %v6029_v56 = vld [vmem:[#allocation9 + $0x28] sm:$0xff]   ;;  %v864_v57 = vrot.slane %v6479_v13, %v6408_v2 }
 0x283   :  { %3590 = vmatprep.subr.bf16.mxu1 %v5976_v58  ;;  %v6030_v58 = vld [vmem:[#allocation9 + $0xa8] sm:$0xff]  }
 0x285   :  { %3509 = vmatpush1.bf16.msra.mxu0 %v5971_v5  ;;  %v6031_v5 = vld [vmem:[#allocation9 + $0x70] sm:$0xff]  }
 0x286   :  { %3591 = vmatpush1.bf16.msra.mxu1 %v5974_v59  ;;  %3510 = vmatprep.subr.bf16.mxu0 %v5979_v60  ;;  %v872_v59 = vrot.slane %v6479_v13, %v6437_v63  ;;  %v6032_v60 = vld [vmem:[#allocation9 + $0xf0] sm:$0xff]   ;;  %v6039_v13 = vld [vmem:[#allocation9 + $0x140] sm:$0xff]  }
 0x287   :  { %3592 = vmatprep.subr.bf16.mxu1 %v5982_v61  ;;  %v6033_v61 = vld [vmem:[#allocation9 + $0x30] sm:$0xff]  }
 0x289   :  { %3511 = vmatpush1.bf16.msra.mxu0 %v5977_v19  ;;  %v5316_v19 = vadd.f32 %v6471_v34, %v864_v57  ;;  %v6041_v34 = vld [vmem:[#allocation9 + $0x100] sm:$0xff]  }
 0x28a   :  { %3593 = vmatpush1.bf16.msra.mxu1 %v5980_v6  ;;  %3512 = vmatprep.subr.bf16.mxu0 %v5985_v8  ;;  %v6034_v6 = vld [vmem:[#allocation9 + $0xb0] sm:$0xff]   ;;  %v6035_v8 = vld [vmem:[#allocation9 + $0x78] sm:$0xff]  }
 0x28b   :  { %3594 = vmatprep.subr.bf16.mxu1 %v5988_v9  ;;  %v5318_v9 = vadd.f32 %v6473_v35, %v872_v59 }
 0x28d   :  { %3513 = vmatpush1.bf16.msra.mxu0 %v5983_v10  ;;  %v6036_v10 = vld [vmem:[#allocation9 + $0xf8] sm:$0xff]  }
 0x28e   :  { %3595 = vmatpush1.bf16.msra.mxu1 %v5986_v11  ;;  %3514 = vmatprep.subr.bf16.mxu0 %v5991_v0  ;;  %v6037_v11 = vld [vmem:[#allocation9 + $0x38] sm:$0xff]   ;;  %v1685_v0 = vmax.f32 %v5316_v19, 0.0 }
 0x28f   :  { %3596 = vmatprep.subr.bf16.mxu1 %v5994_v12  ;;  %v6038_v12 = vld [vmem:[#allocation9 + $0xb8] sm:$0xff]  }
 0x291   :  { %3515 = vmatpush1.bf16.msra.mxu0 %v5989_v14  ;;  %v1687_v14 = vmax.f32 %v5318_v9, 0.0 }
 0x292   :  { %3597 = vmatpush1.bf16.msra.mxu1 %v5992_v39  ;;  %3516 = vmatprep.subr.bf16.mxu0 %v5997_v15  ;;  %v6040_v39 = vld [vmem:[#allocation9 + $0x1c0] sm:$0xff]   ;;  %v1689_v15 = vpack.c.bf16 %v1685_v0, %v1685_v0 }
 0x293   :  { %3598 = vmatprep.subr.bf16.mxu1 %v6000_v16  ;;  %v6042_v16 = vld [vmem:[#allocation9 + $0x180] sm:$0xff]   ;;  %v1691_v35 = vpack.c.bf16 %v1687_v14, %v1687_v14 }
 0x294   :  { %v6074_v14 = vld [vmem:[#allocation9 + $0x280] sm:$0xff]  }
 0x295   :  { %3517 = vmatpush1.bf16.msra.mxu0 %v5995_v20  ;;  %v6045_v20 = vld [vmem:[#allocation9 + $0x108] sm:$0xff]  }
 0x296   :  { %3599 = vmatpush1.bf16.msra.mxu1 %v5998_v21  ;;  %3518 = vmatprep.subr.bf16.mxu0 %v6003_v22  ;;  %v6046_v21 = vld [vmem:[#allocation9 + $0x188] sm:$0xff]   ;;  %v6047_v22 = vld [vmem:[#allocation9 + $0x150] sm:$0xff]  }
 0x297   :  { %3600 = vmatprep.subr.bf16.mxu1 %v6006_v24  ;;  %v6048_v24 = vld [vmem:[#allocation9 + $0x1d0] sm:$0xff]  }
 0x299   :  { %3519 = vmatpush1.bf16.msra.mxu0 %v6001_v27  ;;  %v6051_v27 = vld [vmem:[#allocation9 + $0x158] sm:$0xff]  }
 0x29a   :  { %3601 = vmatpush1.bf16.msra.mxu1 %v6004_v29  ;;  %5184 = vmatprep.subr.bf16.mxu0 %v6007_v30  ;;  %v6053_v29 = vld [vmem:[#allocation9 + $0x118] sm:$0xff]  }
 0x29b   :  { %5206 = vmatprep.subr.bf16.mxu1 %v6008_v31  ;;  %v6054_v30 = vld [vmem:[#allocation9 + $0x198] sm:$0xff]   ;;  %v6055_v31 = vld [vmem:[#allocation9 + $0x160] sm:$0xff]  }
 0x29c   :  { %3521 = vmatmul.mubr.bf16.vlgmr.msra.gmra.mrb[20].mxu0 %v729_v33 }
 0x29d   :  { %3603 = vmatmul.mubr.bf16.vlgmr.msra.gmra.mrb[20].mxu1 %v729_v33  ;;  %5185 = vmatpush3.bf16.msra.mxu0 %v6009_v38  ;;  %v6058_v38 = vld [vmem:[#allocation9 + $0x1a0] sm:$0xff]   ;;  %v6059_v33 = vld [vmem:[#allocation9 + $0x168] sm:$0xff]  }
 0x29e   :  { %4426 = vmatprep.mubr.bf16.mxu0 %v1690_v49  ;;  %5207 = vmatpush3.bf16.msra.mxu1 %v6010_v36  ;;  %v6060_v36 = vld [vmem:[#allocation9 + $0x1e8] sm:$0xff]  }
 0x29f   :  { %4466 = vmatprep.mubr.bf16.mxu1 %v1692_v18  ;;  %5186 = vmatprep.subr.bf16.mxu0 %v6011_v37  ;;  %v6061_v37 = vld [vmem:[#allocation9 + $0x128] sm:$0xff]   ;;  %v6064_v18 = vld [vmem:[#allocation9 + $0x1f0] sm:$0xff]  }
 0x2a0   :  { %5208 = vmatprep.subr.bf16.mxu1 %v6012_v40  ;;  %v6062_v49 = vld [vmem:[#allocation9 + $0x1a8] sm:$0xff]   ;;  %v6063_v40 = vld [vmem:[#allocation9 + $0x170] sm:$0xff]  }
 0x2a1   :  { %5187 = vmatpush3.bf16.msra.mxu0 %v6013_v41  ;;  %v6065_v41 = vld [vmem:[#allocation9 + $0x130] sm:$0xff]  }
 0x2a2   :  { %5209 = vmatpush3.bf16.msra.mxu1 %v6014_v42  ;;  %5188 = vmatprep.subr.bf16.mxu0 %v6015_v1  ;;  %v6066_v42 = vld [vmem:[#allocation9 + $0x1b0] sm:$0xff]   ;;  %v6067_v1 = vld [vmem:[#allocation9 + $0x178] sm:$0xff]  }
 0x2a3   :  { %5210 = vmatprep.subr.bf16.mxu1 %v6016_v43  ;;  %v6068_v43 = vld [vmem:[#allocation9 + $0x1f8] sm:$0xff]  }
 0x2a5   :  { %5189 = vmatpush3.bf16.msra.mxu0 %v6017_v44  ;;  %v6069_v44 = vld [vmem:[#allocation9 + $0x138] sm:$0xff]  }
 0x2a6   :  { %5211 = vmatpush3.bf16.msra.mxu1 %v6018_v45  ;;  %5190 = vmatprep.subr.bf16.mxu0 %v6019_v47  ;;  %v6070_v45 = vld [vmem:[#allocation9 + $0x1b8] sm:$0xff]   ;;  %v6071_v47 = vld [vmem:[#allocation9 + $0x240] sm:$0xff]  }
 0x2a7   :  { %5212 = vmatprep.subr.bf16.mxu1 %v6020_v48  ;;  %v6072_v48 = vld [vmem:[#allocation9 + $0x2c0] sm:$0xff]  }
 0x2a9   :  { %5191 = vmatpush3.bf16.msra.mxu0 %v6021_v50  ;;  %v1822_v50 = vld [vmem:[#allocation7 + $0x4] sm:$0xf] }
 0x2aa   :  { %5213 = vmatpush3.bf16.msra.mxu1 %v6022_v51  ;;  %5192 = vmatprep.subr.bf16.mxu0 %v6023_v52  ;;  %v1827_v51 = vrot.slane %v1822_v50, %v6408_v2  ;;  %v1835_v52 = vrot.slane %v1822_v50, %v6437_v63 }
 0x2ab   :  { %5214 = vmatprep.subr.bf16.mxu1 %v6024_v62  ;;  %v1831_v62 = vrot.slane %v1822_v50, %v6413_v4 }
 0x2ad   :  { %5193 = vmatpush3.bf16.msra.mxu0 %v6025_v53  ;;  %v1839_v53 = vrot.slane %v1822_v50, %v6420_v7 }
 0x2ae   :  { %5215 = vmatpush3.bf16.msra.mxu1 %v6026_v54  ;;  %5194 = vmatprep.subr.bf16.mxu0 %v6027_v55 }
 0x2af   :  { %5216 = vmatprep.subr.bf16.mxu1 %v6028_v46 }
 0x2b1   :  { %5195 = vmatpush3.bf16.msra.mxu0 %v6029_v56 }
 0x2b2   :  { %5217 = vmatpush3.bf16.msra.mxu1 %v6030_v58  ;;  %5196 = vmatprep.subr.bf16.mxu0 %v6031_v5 }
 0x2b3   :  { %5218 = vmatprep.subr.bf16.mxu1 %v6032_v60 }
 0x2b5   :  { %5197 = vmatpush3.bf16.msra.mxu0 %v6033_v61 }
 0x2b6   :  { %5219 = vmatpush3.bf16.msra.mxu1 %v6034_v6  ;;  %5198 = vmatprep.subr.bf16.mxu0 %v6035_v8 }
 0x2b7   :  { %5220 = vmatprep.subr.bf16.mxu1 %v6036_v10 }
 0x2b9   :  { %5199 = vmatpush3.bf16.msra.mxu0 %v6037_v11 }
 0x2ba   :  { %5221 = vmatpush3.bf16.msra.mxu1 %v6038_v12  ;;  %5228 = vmatprep.subr.bf16.mxu0 %v6039_v13  ;;  %v6073_v13 = vld [vmem:[#allocation9 + $0x200] sm:$0xff]  }
 0x2bb   :  { %5250 = vmatprep.subr.bf16.mxu1 %v6040_v39 }
 0x2bc   :  { %4427 = vmatmul.mubr.bf16.vlgmr.msra.gmra.mrb[24].mxu0 %v1689_v15  ;;  %v6075_v15 = vld [vmem:[#allocation9 + $0x248] sm:$0xff]  }
 0x2bd   :  { %4467 = vmatmul.mubr.bf16.vlgmr.msra.gmra.mrb[24].mxu1 %v1691_v35  ;;  %5229 = vmatpush3.bf16.msra.mxu0 %v6041_v34  ;;  %v6078_v35 = vld [vmem:[#allocation9 + $0x288] sm:$0xff]  }
 0x2be   :  { %5251 = vmatpush3.bf16.msra.mxu1 %v6042_v16  ;;  %5230 = vmatprep.subr.bf16.mxu0 %v6043_v17  ;;  %v6076_v16 = vld [vmem:[#allocation9 + $0x2c8] sm:$0xff]  }
 0x2bf   :  { %5252 = vmatprep.subr.bf16.mxu1 %v6044_v23  ;;  %v6077_v17 = vld [vmem:[#allocation9 + $0x208] sm:$0xff]   ;;  %v6079_v23 = vld [vmem:[#allocation9 + $0x250] sm:$0xff]  }
 0x2c1   :  { %5231 = vmatpush3.bf16.msra.mxu0 %v6045_v20  ;;  %v6080_v20 = vld [vmem:[#allocation9 + $0x2d0] sm:$0xff]  }
 0x2c2   :  { %5253 = vmatpush3.bf16.msra.mxu1 %v6046_v21  ;;  %5232 = vmatprep.subr.bf16.mxu0 %v6047_v22  ;;  %v6081_v21 = vld [vmem:[#allocation9 + $0x210] sm:$0xff]  }
 0x2c3   :  { %5254 = vmatprep.subr.bf16.mxu1 %v6048_v24  ;;  %v6082_v22 = vld [vmem:[#allocation9 + $0x290] sm:$0xff]   ;;  %v6083_v24 = vld [vmem:[#allocation9 + $0x258] sm:$0xff]  }
 0x2c5   :  { %5233 = vmatpush3.bf16.msra.mxu0 %v6049_v25  ;;  %v6084_v25 = vld [vmem:[#allocation9 + $0x2d8] sm:$0xff]  }
 0x2c6   :  { %5255 = vmatpush3.bf16.msra.mxu1 %v6050_v26  ;;  %5234 = vmatprep.subr.bf16.mxu0 %v6051_v27  ;;  %v6085_v26 = vld [vmem:[#allocation9 + $0x218] sm:$0xff]  }
 0x2c7   :  { %5256 = vmatprep.subr.bf16.mxu1 %v6052_v28  ;;  %v6086_v27 = vld [vmem:[#allocation9 + $0x298] sm:$0xff]   ;;  %v6087_v28 = vld [vmem:[#allocation9 + $0x260] sm:$0xff]  }
 0x2c9   :  { %5235 = vmatpush3.bf16.msra.mxu0 %v6053_v29  ;;  %v6088_v29 = vld [vmem:[#allocation9 + $0x2e0] sm:$0xff]  }
 0x2ca   :  { %5257 = vmatpush3.bf16.msra.mxu1 %v6054_v30  ;;  %5236 = vmatprep.subr.bf16.mxu0 %v6055_v31  ;;  %v6089_v30 = vld [vmem:[#allocation9 + $0x220] sm:$0xff]  }
 0x2cb   :  { %5258 = vmatprep.subr.bf16.mxu1 %v6056_v3  ;;  %v6090_v31 = vld [vmem:[#allocation9 + $0x2a0] sm:$0xff]   ;;  %v6091_v3 = vld [vmem:[#allocation9 + $0x268] sm:$0xff]  }
 0x2cd   :  { %5237 = vmatpush3.bf16.msra.mxu0 %v6057_v32  ;;  %v6092_v32 = vld [vmem:[#allocation9 + $0x2e8] sm:$0xff]  }
 0x2ce   :  { %5259 = vmatpush3.bf16.msra.mxu1 %v6058_v38  ;;  %5238 = vmatprep.subr.bf16.mxu0 %v6059_v33  ;;  %v6093_v38 = vld [vmem:[#allocation9 + $0x228] sm:$0xff]  }
 0x2cf   :  { %5260 = vmatprep.subr.bf16.mxu1 %v6060_v36  ;;  %v6094_v33 = vld [vmem:[#allocation9 + $0x2a8] sm:$0xff]   ;;  %v6095_v36 = vld [vmem:[#allocation9 + $0x270] sm:$0xff]  }
 0x2d1   :  { %5239 = vmatpush3.bf16.msra.mxu0 %v6061_v37  ;;  %v6096_v37 = vld [vmem:[#allocation9 + $0x2f0] sm:$0xff]  }
 0x2d2   :  { %5261 = vmatpush3.bf16.msra.mxu1 %v6062_v49  ;;  %5240 = vmatprep.subr.bf16.mxu0 %v6063_v40  ;;  %v6097_v49 = vld [vmem:[#allocation9 + $0x230] sm:$0xff]  }
 0x2d3   :  { %5262 = vmatprep.subr.bf16.mxu1 %v6064_v18  ;;  %v6098_v40 = vld [vmem:[#allocation9 + $0x2b0] sm:$0xff]   ;;  %v6099_v18 = vld [vmem:[#allocation9 + $0x278] sm:$0xff]  }
 0x2d5   :  { %5241 = vmatpush3.bf16.msra.mxu0 %v6065_v41  ;;  %v6100_v41 = vld [vmem:[#allocation9 + $0x2f8] sm:$0xff]  }
 0x2d6   :  { %5263 = vmatpush3.bf16.msra.mxu1 %v6066_v42  ;;  %5242 = vmatprep.subr.bf16.mxu0 %v6067_v1  ;;  %v6101_v42 = vld [vmem:[#allocation9 + $0x238] sm:$0xff]  }
 0x2d7   :  { %5264 = vmatprep.subr.bf16.mxu1 %v6068_v43  ;;  %v6102_v1 = vld [vmem:[#allocation9 + $0x2b8] sm:$0xff]  }
 0x2d8   :  { %v2785_v43 = vld [vmem:[#allocation7 + $0x8] sm:$0xf] }
 0x2d9   :  { %5243 = vmatpush3.bf16.msra.mxu0 %v6069_v44  ;;  %v2790_v44 = vrot.slane %v2785_v43, %v6408_v2 }
 0x2da   :  { %5265 = vmatpush3.bf16.msra.mxu1 %v6070_v45  ;;  %5272 = vmatprep.subr.bf16.mxu0 %v6071_v47  ;;  %v2798_v45 = vrot.slane %v2785_v43, %v6437_v63  ;;  %v2794_v47 = vrot.slane %v2785_v43, %v6413_v4 }
 0x2db   :  { %5294 = vmatprep.subr.bf16.mxu1 %v6072_v48  ;;  %v2802_v48 = vrot.slane %v2785_v43, %v6420_v7 }
 0x2ef   :  { %v2559_v54 = vpop.f32.mrb[16].mxu0  ;;  %v2641_v55 = vpop.f32.mrb[16].mxu1 }
 0x2f0   :  { %v5320_v46 = vadd.f32 %v2559_v54, %v1827_v51  ;;  %v5322_v56 = vadd.f32 %v2641_v55, %v1835_v52  ;;  %v2561_v57 = vpop.f32.mrb[17].mxu0  ;;  %v2643_v58 = vpop.f32.mrb[17].mxu1 }
 0x2f1   :  { %v5321_v5 = vadd.f32 %v2561_v57, %v1831_v62  ;;  %v5323_v59 = vadd.f32 %v2643_v58, %v1839_v53  ;;  %v2563_v60 = vpop.f32.mrb[18].mxu0  ;;  %v2645_v61 = vpop.f32.mrb[18].mxu1 }
 0x2f2   :  { %v2648_v19 = vmax.f32 %v5320_v46, 0.0  ;;  %v2650_v6 = vmax.f32 %v5322_v56, 0.0  ;;  %v2564_v8 = vpop.f32.mrb[19].mxu0  ;;  %v2646_v9 = vpop.f32.mrb[19].mxu1 }
 0x2f3   :  { %v2649_v10 = vmax.f32 %v5321_v5, 0.0  ;;  %v2651_v11 = vmax.f32 %v5323_v59, 0.0  ;;  %v5087_v9 = vld [vmem:[#allocation10] ss:$0 sm:$0xff] }
 0x2f4   :  { %v2652_v39 = vpack.c.bf16 %v2648_v19, %v2648_v19  ;;  %v2654_v34 = vpack.c.bf16 %v2650_v6, %v2650_v6 }
 0x2f5   :  { %v2653_v0 = vpack.c.bf16 %v2649_v10, %v2649_v10  ;;  %v2655_v12 = vpack.c.bf16 %v2651_v11, %v2651_v11 }
 0x2f7   :  { %4506 = vmatprep.mubr.bf16.mxu0 %v2653_v0  ;;  %4546 = vmatprep.mubr.bf16.mxu1 %v2655_v12 }
 0x2f8   :  { %4507 = vmatmul.mubr.bf16.vlgmr.msra.gmra.mrb[28].mxu0 %v2652_v39  ;;  %4547 = vmatmul.mubr.bf16.vlgmr.msra.gmra.mrb[28].mxu1 %v2654_v34 }
 0x2f9   :  { %5273 = vmatpush3.bf16.msra.mxu0 %v6073_v13  ;;  %5295 = vmatpush3.bf16.msra.mxu1 %v6074_v14 }
 0x2fa   :  { %5274 = vmatprep.subr.bf16.mxu0 %v6075_v15  ;;  %5296 = vmatprep.subr.bf16.mxu1 %v6076_v16 }
 0x2fd   :  { %5275 = vmatpush3.bf16.msra.mxu0 %v6077_v17  ;;  %5297 = vmatpush3.bf16.msra.mxu1 %v6078_v35 }
 0x2fe   :  { %5276 = vmatprep.subr.bf16.mxu0 %v6079_v23  ;;  %5298 = vmatprep.subr.bf16.mxu1 %v6080_v20 }
 0x301   :  { %5277 = vmatpush3.bf16.msra.mxu0 %v6081_v21  ;;  %5299 = vmatpush3.bf16.msra.mxu1 %v6082_v22 }
 0x302   :  { %5278 = vmatprep.subr.bf16.mxu0 %v6083_v24  ;;  %5300 = vmatprep.subr.bf16.mxu1 %v6084_v25 }
 0x305   :  { %5279 = vmatpush3.bf16.msra.mxu0 %v6085_v26  ;;  %5301 = vmatpush3.bf16.msra.mxu1 %v6086_v27 }
 0x306   :  { %5280 = vmatprep.subr.bf16.mxu0 %v6087_v28  ;;  %5302 = vmatprep.subr.bf16.mxu1 %v6088_v29 }
 0x309   :  { %5281 = vmatpush3.bf16.msra.mxu0 %v6089_v30  ;;  %5303 = vmatpush3.bf16.msra.mxu1 %v6090_v31 }
 0x30a   :  { %5282 = vmatprep.subr.bf16.mxu0 %v6091_v3  ;;  %5304 = vmatprep.subr.bf16.mxu1 %v6092_v32 }
 0x30d   :  { %5283 = vmatpush3.bf16.msra.mxu0 %v6093_v38  ;;  %5305 = vmatpush3.bf16.msra.mxu1 %v6094_v33 }
 0x30e   :  { %5284 = vmatprep.subr.bf16.mxu0 %v6095_v36  ;;  %5306 = vmatprep.subr.bf16.mxu1 %v6096_v37 }
 0x311   :  { %5285 = vmatpush3.bf16.msra.mxu0 %v6097_v49  ;;  %5307 = vmatpush3.bf16.msra.mxu1 %v6098_v40 }
 0x312   :  { %5286 = vmatprep.subr.bf16.mxu0 %v6099_v18  ;;  %5308 = vmatprep.subr.bf16.mxu1 %v6100_v41 }
 0x315   :  { %5287 = vmatpush3.bf16.msra.mxu0 %v6101_v42  ;;  %5309 = vmatpush3.bf16.msra.mxu1 %v6102_v1 }
 0x36f   :  { %v3522_v50 = vpop.f32.mrb[20].mxu0 }
 0x370   :  { %v5324_v51 = vadd.f32 %v3522_v50, %v2790_v44  ;;  %v3604_v52 = vpop.f32.mrb[20].mxu1  ;;  %v3524_v62 = vpop.f32.mrb[21].mxu0 }
 0x371   :  { %v5326_v53 = vadd.f32 %v3604_v52, %v2798_v45  ;;  %v5325_v54 = vadd.f32 %v3524_v62, %v2794_v47  ;;  %v3606_v55 = vpop.f32.mrb[21].mxu1  ;;  %v3526_v46 = vpop.f32.mrb[22].mxu0 }
 0x372   :  { %v3611_v56 = vmax.f32 %v5324_v51, 0.0  ;;  %v5327_v57 = vadd.f32 %v3606_v55, %v2802_v48  ;;  %v3608_v58 = vpop.f32.mrb[22].mxu1  ;;  %v3527_v5 = vpop.f32.mrb[23].mxu0 }
 0x373   :  { %v3613_v59 = vmax.f32 %v5326_v53, 0.0  ;;  %v3612_v2 = vmax.f32 %v5325_v54, 0.0  ;;  %v3609_v60 = vpop.f32.mrb[23].mxu1 }
 0x374   :  { %v3614_v63 = vmax.f32 %v5327_v57, 0.0  ;;  %v3615_v4 = vpack.c.bf16 %v3611_v56, %v3611_v56 }
 0x375   :  { %v3616_v61 = vpack.c.bf16 %v3612_v2, %v3612_v2  ;;  %v3617_v7 = vpack.c.bf16 %v3613_v59, %v3613_v59 }
 0x376   :  { %v3618_v19 = vpack.c.bf16 %v3614_v63, %v3614_v63 }
 0x377   :  { %4586 = vmatprep.mubr.bf16.mxu0 %v3616_v61 }
 0x378   :  { %4626 = vmatprep.mubr.bf16.mxu1 %v3618_v19  ;;  %4587 = vmatmul.mubr.bf16.vlgmr.msra.gmra.mrb[32].mxu0 %v3615_v4 }
 0x379   :  { %4627 = vmatmul.mubr.bf16.vlgmr.msra.gmra.mrb[32].mxu1 %v3617_v7 }
 0x38f   :  { %v5200_v6 = vpop.f32.mrb[24].mxu0 }
 0x390   :  { %v5222_v8 = vpop.f32.mrb[24].mxu1  ;;  %v5201_v10 = vpop.f32.mrb[25].mxu0 }
 0x391   :  { %v5202_v11 = vadd.f32 %v5201_v10, %v5200_v6  ;;  %v5223_v0 = vpop.f32.mrb[25].mxu1  ;;  %v5203_v12 = vpop.f32.mrb[26].mxu0 }
 0x392   :  { %v5224_v13 = vadd.f32 %v5223_v0, %v5222_v8  ;;  %v5225_v14 = vpop.f32.mrb[26].mxu1  ;;  %v5204_v39 = vpop.f32.mrb[27].mxu0 }
 0x393   :  { %v4429_v34 = vadd.f32 %v5202_v11, %v5087_v9  ;;  %v5226_v15 = vpop.f32.mrb[27].mxu1 }
 0x395   :  { %v4469_v16 = vadd.f32 %v5224_v13, %v4429_v34 }
 0x3cb   :  { %v5244_v17 = vpop.f32.mrb[28].mxu0  ;;  %v5266_v35 = vpop.f32.mrb[28].mxu1 }
 0x3cc   :  { %v5245_v23 = vpop.f32.mrb[29].mxu0  ;;  %v5267_v20 = vpop.f32.mrb[29].mxu1 }
 0x3cd   :  { %v5246_v21 = vadd.f32 %v5245_v23, %v5244_v17  ;;  %v5268_v22 = vadd.f32 %v5267_v20, %v5266_v35  ;;  %v5247_v24 = vpop.f32.mrb[30].mxu0  ;;  %v5269_v25 = vpop.f32.mrb[30].mxu1 }
 0x3ce   :  { %v5248_v26 = vpop.f32.mrb[31].mxu0  ;;  %v5270_v27 = vpop.f32.mrb[31].mxu1 }
 0x3cf   :  { %v4509_v28 = vadd.f32 %v5246_v21, %v4469_v16 }
 0x3d1   :  { %v4549_v29 = vadd.f32 %v5268_v22, %v4509_v28 }
 0x44b   :  { %v5288_v30 = vpop.f32.mrb[32].mxu0 }
 0x44c   :  { %v5310_v31 = vpop.f32.mrb[32].mxu1  ;;  %v5289_v3 = vpop.f32.mrb[33].mxu0 }
 0x44d   :  { %v5290_v32 = vadd.f32 %v5289_v3, %v5288_v30  ;;  %v5311_v38 = vpop.f32.mrb[33].mxu1  ;;  %v5291_v33 = vpop.f32.mrb[34].mxu0 }
 0x44e   :  { %v5312_v36 = vadd.f32 %v5311_v38, %v5310_v31  ;;  %v5313_v37 = vpop.f32.mrb[34].mxu1  ;;  %v5292_v49 = vpop.f32.mrb[35].mxu0 }
 0x44f   :  { %v4589_v40 = vadd.f32 %v5290_v32, %v4549_v29  ;;  %v5314_v18 = vpop.f32.mrb[35].mxu1 }
 0x451   :  { %v4629_v41 = vadd.f32 %v5312_v36, %v4589_v40 }
 0x453   :  { %4634 = vst [vmem:[%s6512_s7] sm:$0xff] %v4629_v41 }
 0x454   :  { %4639 = vsyncpa [#allocation3], 1 }
 0x455   :  { %4640 = vsyncpa [#allocation5], 1 }
 0x456   :  { %4641 = vsyncpa [#allocation8], 1 }
 0x457   :  { %4642 = vsyncpa [#allocation11], 1 }

</bundles_post_ra>
